<compile_context>
chip_gen: v5e
topology: v5e:2x2
jax: 0.10.0
libtpu: 0.0.40
codegen_flags: <defaults>
</compile_context>

<pallas_src>
import math
import functools

import jax
import jax.numpy as jnp
from jax.experimental import pallas as pl
from jax.experimental.pallas import tpu as pltpu

LANE = 128


def _round_up(x, m):
    return (x + m - 1) // m * m


def _choose_adj_tile(n):
    """Target 512x512 adjacency tiles; shrink for small graphs (always a mult of 128)."""
    return min(512, _round_up(n, LANE))


def _support_tile_m(n_pad, adj_tile):
    """Grow the support row tile up to 1024 while it still divides n_pad."""
    t = adj_tile
    while t * 2 <= min(n_pad, 1024) and n_pad % (t * 2) == 0:
        t *= 2
    return t


# ----------------------------------------------------------------------------
# Capability probes (run once, outside jit)
# ----------------------------------------------------------------------------
def _probe_copy_kernel(x_ref, o_ref):
    o_ref[...] = x_ref[...]


@functools.lru_cache(maxsize=None)
def _buffered_one_supported():
    """True if pl.BlockSpec(..., pipeline_mode=pl.Buffered(1)) compiles & runs here."""
    try:
        spec = pl.BlockSpec((8, LANE), lambda i: (0, 0), pipeline_mode=pl.Buffered(1))
    except Exception:
        return False
    try:
        out = pl.pallas_call(
            _probe_copy_kernel,
            out_shape=jax.ShapeDtypeStruct((8, LANE), jnp.float32),
            grid=(1,),
            in_specs=[spec],
            out_specs=pl.BlockSpec((8, LANE), lambda i: (0, 0)),
        )(jnp.zeros((8, LANE), jnp.float32))
        jax.block_until_ready(out)
        return True
    except Exception:
        return False


@functools.lru_cache(maxsize=None)
def _vmem_limit_bytes():
    """~3/4 of physical VMEM (96 MiB on v5e/v6e, 48 MiB on v7x); safe fallback 48 MiB."""
    cap = 64 * 1024 * 1024  # conservative default (v7x physical VMEM)
    try:
        info = pltpu.get_tpu_info()
        for name in ("vmem_capacity_bytes", "vmem_size_bytes", "vmem_bytes"):
            v = getattr(info, name, None)
            if isinstance(v, int) and v > 0:
                cap = v
                break
    except Exception:
        pass
    return max(32 * 1024 * 1024, min(int(cap * 3 // 4), 100 * 1024 * 1024))


def _resident_spec(shape, index_map, single_buffer):
    """BlockSpec for an operand whose block index is constant: single-buffer if possible."""
    if single_buffer:
        return pl.BlockSpec(shape, index_map, pipeline_mode=pl.Buffered(1))
    return pl.BlockSpec(shape, index_map)


# ----------------------------------------------------------------------------
# Kernel A: support1 = x_pad @ W1_pad   (row-tiled, lane-padded)
# ----------------------------------------------------------------------------
def support_kernel(x_ref, w_ref, out_ref):
    out_ref[...] = jnp.dot(
        x_ref[...], w_ref[...], preferred_element_type=jnp.float32
    ).astype(out_ref.dtype)


def compute_support(x, w, *, out_dtype, tile_m, vmem_limit, single_buffer):
    n, f_in = x.shape
    f_out = w.shape[1]
    return pl.pallas_call(
        support_kernel,
        out_shape=jax.ShapeDtypeStruct((n, f_out), out_dtype),
        grid_spec=pltpu.PrefetchScalarGridSpec(
            num_scalar_prefetch=0,
            grid=(n // tile_m,),
            in_specs=[
                pl.BlockSpec((tile_m, f_in), lambda i: (i, 0)),              # x rows streamed
                _resident_spec((f_in, f_out), lambda i: (0, 0), single_buffer),  # W resident
            ],
            out_specs=pl.BlockSpec((tile_m, f_out), lambda i: (i, 0)),
        ),
        compiler_params=pltpu.CompilerParams(
            dimension_semantics=("parallel",),
            vmem_limit_bytes=vmem_limit,
        ),
    )(x, w)


# ----------------------------------------------------------------------------
# Kernel B: sup2 = relu(adj @ support1 + b1) @ W2   (layer-2 support fused in epilogue)
# ----------------------------------------------------------------------------
def layer1_fused_kernel(adj_ref, sup1_ref, b1_ref, w2_ref, out_ref, acc_ref,
                        *, tile_k, apply_relu):
    k = pl.program_id(1)

    @pl.when(k == 0)
    def _():
        acc_ref[...] = jnp.zeros_like(acc_ref)

    start = pl.multiple_of(k * tile_k, tile_k)
    acc_ref[...] += jnp.dot(adj_ref[...], sup1_ref[pl.ds(start, tile_k), :],
                            preferred_element_type=jnp.float32)

    @pl.when(k == pl.num_programs(1) - 1)
    def _():
        h = acc_ref[...] + b1_ref[...]
        if apply_relu:
            h = jnp.maximum(h, 0.0)
        # Dropout: eval-mode identity.
        # Fused layer-2 support matmul: hidden never touches HBM.
        out_ref[...] = jnp.dot(h, w2_ref[...],
                               preferred_element_type=jnp.float32).astype(out_ref.dtype)


def gcn_layer1_fused(adj, sup1, b1, w2, *, apply_relu, out_dtype, tile,
                     vmem_limit, single_buffer):
    n_pad = adj.shape[0]
    h_pad = sup1.shape[1]
    c_pad = w2.shape[1]
    kernel = functools.partial(layer1_fused_kernel, tile_k=tile, apply_relu=apply_relu)
    return pl.pallas_call(
        kernel,
        out_shape=jax.ShapeDtypeStruct((n_pad, c_pad), out_dtype),
        grid_spec=pltpu.PrefetchScalarGridSpec(
            num_scalar_prefetch=0,
            grid=(n_pad // tile, n_pad // tile),
            in_specs=[
                pl.BlockSpec((tile, tile), lambda i, k: (i, k)),                      # adj streamed
                _resident_spec((n_pad, h_pad), lambda i, k: (0, 0), single_buffer),   # support1
                _resident_spec((1, h_pad), lambda i, k: (0, 0), single_buffer),       # bias1
                _resident_spec((h_pad, c_pad), lambda i, k: (0, 0), single_buffer),   # W2
            ],
            out_specs=pl.BlockSpec((tile, c_pad), lambda i, k: (i, 0)),
            scratch_shapes=[pltpu.VMEM((tile, h_pad), jnp.float32)],
        ),
        compiler_params=pltpu.CompilerParams(
            dimension_semantics=("parallel", "arbitrary"),
            vmem_limit_bytes=vmem_limit,
        ),
    )(adj, sup1, b1, w2)


# ----------------------------------------------------------------------------
# Kernel C: logits = adj @ sup2 + b2  (accumulate directly into f32 output block)
# ----------------------------------------------------------------------------
def layer2_kernel(adj_ref, sup2_ref, b2_ref, out_ref, *, tile_k):
    k = pl.program_id(1)

    @pl.when(k == 0)
    def _():
        out_ref[...] = jnp.broadcast_to(b2_ref[...], out_ref.shape)

    start = pl.multiple_of(k * tile_k, tile_k)
    out_ref[...] += jnp.dot(adj_ref[...], sup2_ref[pl.ds(start, tile_k), :],
                            preferred_element_type=jnp.float32)


def gcn_layer2(adj, sup2, b2, *, tile, vmem_limit, single_buffer):
    n_pad = adj.shape[0]
    c_pad = sup2.shape[1]
    kernel = functools.partial(layer2_kernel, tile_k=tile)
    return pl.pallas_call(
        kernel,
        out_shape=jax.ShapeDtypeStruct((n_pad, c_pad), jnp.float32),
        grid_spec=pltpu.PrefetchScalarGridSpec(
            num_scalar_prefetch=0,
            grid=(n_pad // tile, n_pad // tile),
            in_specs=[
                pl.BlockSpec((tile, tile), lambda i, k: (i, k)),                    # adj streamed
                _resident_spec((n_pad, c_pad), lambda i, k: (0, 0), single_buffer),  # support2
                _resident_spec((1, c_pad), lambda i, k: (0, 0), single_buffer),      # bias2
            ],
            out_specs=pl.BlockSpec((tile, c_pad), lambda i, k: (i, 0)),
        ),
        compiler_params=pltpu.CompilerParams(
            dimension_semantics=("parallel", "arbitrary"),
            vmem_limit_bytes=vmem_limit,
        ),
    )(adj, sup2, b2)


# ----------------------------------------------------------------------------
# GCN parameters + forward (mirrors the PyTorch module)
# ----------------------------------------------------------------------------
def init_gcn_params(key, nfeat, nhid, nclass):
    k1, k2, k3, k4 = jax.random.split(key, 4)
    stdv1 = 1.0 / math.sqrt(nhid)
    stdv2 = 1.0 / math.sqrt(nclass)
    return {
        "gc1_w": jax.random.uniform(k1, (nfeat, nhid), jnp.float32, -stdv1, stdv1),
        "gc1_b": jax.random.uniform(k2, (nhid,), jnp.float32, -stdv1, stdv1),
        "gc2_w": jax.random.uniform(k3, (nhid, nclass), jnp.float32, -stdv2, stdv2),
        "gc2_b": jax.random.uniform(k4, (nclass,), jnp.float32, -stdv2, stdv2),
    }


@functools.partial(jax.jit, static_argnames=(
    "use_relu", "use_bf16_adj", "adj_tile", "n_pad", "f_in_pad", "h_pad",
    "c_pad", "sup_tile_m", "vmem_limit", "single_buffer"))
def _gcn_forward_impl(params, x, adj, *, use_relu, use_bf16_adj, adj_tile, n_pad,
                      f_in_pad, h_pad, c_pad, sup_tile_m, vmem_limit, single_buffer):
    N, nfeat = x.shape
    nhid = params["gc1_w"].shape[1]
    nclass = params["gc2_w"].shape[1]
    mm_dtype = jnp.bfloat16 if use_bf16_adj else jnp.float32

    # Zero-pad once (numerically exact). bf16 adjacency halves the dominant HBM
    # stream on all generations (v5e benefits most: lowest HBM BW, native bf16 MXU).
    x_p = jnp.pad(x.astype(jnp.float32), ((0, n_pad - N), (0, f_in_pad - nfeat)))
    adj_p = jnp.pad(adj.astype(jnp.float32),
                    ((0, n_pad - N), (0, n_pad - N))).astype(mm_dtype)
    w1 = jnp.pad(params["gc1_w"].astype(jnp.float32),
                 ((0, f_in_pad - nfeat), (0, h_pad - nhid)))
    b1 = jnp.pad(params["gc1_b"].astype(jnp.float32), (0, h_pad - nhid)).reshape(1, h_pad)
    w2 = jnp.pad(params["gc2_w"].astype(jnp.float32),
                 ((0, h_pad - nhid), (0, c_pad - nclass)))
    b2 = jnp.pad(params["gc2_b"].astype(jnp.float32), (0, c_pad - nclass)).reshape(1, c_pad)

    # Layer 1 support (hoisted, computed once).
    sup1 = compute_support(x_p, w1, out_dtype=mm_dtype, tile_m=sup_tile_m,
                           vmem_limit=vmem_limit, single_buffer=single_buffer)
    # Layer 1 adj matmul with fused bias/ReLU/dropout(eval)/W2 epilogue -> layer-2 support.
    sup2 = gcn_layer1_fused(adj_p, sup1, b1, w2, apply_relu=use_relu,
                            out_dtype=mm_dtype, tile=adj_tile,
                            vmem_limit=vmem_limit, single_buffer=single_buffer)
    # Layer 2 adj matmul + bias (accumulates straight into the f32 output block).
    out_pad = gcn_layer2(adj_p, sup2, b2, tile=adj_tile,
                         vmem_limit=vmem_limit, single_buffer=single_buffer)
    return out_pad[:N, :nclass]


def gcn_forward(params, x, adj, use_relu=True, use_bf16_adj=True, adj_tile=None):
    """
    x:   (N, nfeat) node features
    adj: (N, N)     dense (row-normalized) adjacency
    Returns (N, nclass) logits; same semantics as GCN.forward in eval mode.
    """
    N, nfeat = x.shape
    nhid = params["gc1_w"].shape[1]
    nclass = params["gc2_w"].shape[1]
    if adj_tile is None:
        adj_tile = _choose_adj_tile(N)
    n_pad = _round_up(N, adj_tile)
    return _gcn_forward_impl(
        params, x, adj,
        use_relu=bool(use_relu),
        use_bf16_adj=bool(use_bf16_adj),
        adj_tile=int(adj_tile),
        n_pad=int(n_pad),
        f_in_pad=int(_round_up(nfeat, LANE)),
        h_pad=int(_round_up(nhid, LANE)),
        c_pad=int(_round_up(nclass, LANE)),
        sup_tile_m=int(_support_tile_m(n_pad, adj_tile)),
        vmem_limit=int(_vmem_limit_bytes()),
        single_buffer=bool(_buffered_one_supported()),
    )


# ----------------------------------------------------------------------------
# Pure-JAX reference (high-precision matmuls) for correctness check
# ----------------------------------------------------------------------------
def gcn_reference(params, x, adj, use_relu=True):
    hp = jax.lax.Precision.HIGHEST
    h = jnp.dot(adj, jnp.dot(x, params["gc1_w"], precision=hp), precision=hp) + params["gc1_b"]
    if use_relu:
        h = jnp.maximum(h, 0.0)
    return jnp.dot(adj, jnp.dot(h, params["gc2_w"], precision=hp), precision=hp) + params["gc2_b"]


if __name__ == "__main__":
    key = jax.random.PRNGKey(0)
    # N deliberately NOT a multiple of 128 to exercise the padding path.
    N, nfeat, nhid, nclass = 300, 64, 32, 16

    kp, kx, ka = jax.random.split(key, 3)
    params = init_gcn_params(kp, nfeat, nhid, nclass)
    x = jax.random.normal(kx, (N, nfeat), jnp.float32)
    adj_raw = jax.random.uniform(ka, (N, N), jnp.float32)
    adj = adj_raw / jnp.sum(adj_raw, axis=1, keepdims=True)   # row-normalized dense adjacency

    ref = gcn_reference(params, x, adj, use_relu=True)

    # f32 path, small tile override -> 3x3 adjacency grid (multi-step accumulation + padding).
    out_f32 = gcn_forward(params, x, adj, use_relu=True, use_bf16_adj=False, adj_tile=128)
    jax.block_until_ready(out_f32)
    assert out_f32.shape == (N, nclass)
    assert jnp.allclose(out_f32, ref, atol=1e-2, rtol=1e-2), "f32 path mismatch"

    # bf16-adjacency path with default (large) tiles.
    out_bf16 = gcn_forward(params, x, adj, use_relu=True, use_bf16_adj=True)
    jax.block_until_ready(out_bf16)
    assert out_bf16.shape == (N, nclass)
    assert jnp.allclose(out_bf16, ref, atol=5e-2, rtol=5e-2), "bf16 path mismatch"

    print("KERNEL_OK")
</pallas_src>

<mosaic_0001>
module attributes {stable_mosaic.version = 11 : i64} {
  func.func @_probe_copy_kernel(%arg0: i32, %arg1: memref<8x128xf32, #tpu.memory_space<vmem>>, %arg2: memref<8x128xf32, #tpu.memory_space<vmem>>) attributes {dimension_semantics = [#tpu.dimension_semantics<arbitrary>], iteration_bounds = array<i64: 1>, scalar_prefetch = 0 : i64, scratch_operands = 0 : i64, tpu.core_type = #tpu.core_type<tc>, window_params = [{pipeline_mode = #tpu.pipeline_mode<synchronous>, transform_indices = @transform_0, window_bounds = array<i64: 8, 128>}, {pipeline_mode = #tpu.pipeline_mode<synchronous>, transform_indices = @transform_1, window_bounds = array<i64: 8, 128>}]} {
    %c0 = arith.constant 0 : index
    %c0_0 = arith.constant 0 : index
    %0 = vector.load %arg1[%c0, %c0_0] : memref<8x128xf32, #tpu.memory_space<vmem>>, vector<8x128xf32>
    %c0_1 = arith.constant 0 : index
    %c0_2 = arith.constant 0 : index
    %1 = vector.load %arg2[%c0_1, %c0_2] : memref<8x128xf32, #tpu.memory_space<vmem>>, vector<8x128xf32>
    tpu.vector_store %arg2[%c0_1, %c0_2], %0 {strides = array<i32>} : memref<8x128xf32, #tpu.memory_space<vmem>>, vector<8x128xf32>,
    return
  }
  func.func @transform_0(%arg0: i32) -> (i32, i32) {
    %c0_i32 = arith.constant 0 : i32
    %c0_i32_0 = arith.constant 0 : i32
    %c0_i32_1 = arith.constant 0 : i32
    return %c0_i32, %c0_i32_0 : i32, i32
  }
  func.func @transform_1(%arg0: i32) -> (i32, i32) {
    %c0_i32 = arith.constant 0 : i32
    %c0_i32_0 = arith.constant 0 : i32
    %c0_i32_1 = arith.constant 0 : i32
    return %c0_i32, %c0_i32_0 : i32, i32
  }
}

module attributes {stable_mosaic.version = 11 : i64} {
  func.func @layer1_fused_kernel(%arg0: i32, %arg1: i32, %arg2: memref<128x128xf32, #tpu.memory_space<vmem>>, %arg3: memref<384x128xf32, #tpu.memory_space<vmem>>, %arg4: memref<1x128xf32, #tpu.memory_space<vmem>>, %arg5: memref<128x128xf32, #tpu.memory_space<vmem>>, %arg6: memref<128x128xf32, #tpu.memory_space<vmem>>, %arg7: memref<128x128xf32, #tpu.memory_space<vmem>>) attributes {dimension_semantics = [#tpu.dimension_semantics<parallel>, #tpu.dimension_semantics<arbitrary>], iteration_bounds = array<i64: 3, 3>, scalar_prefetch = 0 : i64, scratch_operands = 1 : i64, tpu.core_type = #tpu.core_type<tc>, window_params = [{transform_indices = @transform_0, window_bounds = array<i64: 128, 128>}, {pipeline_mode = #tpu.pipeline_mode<synchronous>, transform_indices = @transform_1, window_bounds = array<i64: 384, 128>}, {pipeline_mode = #tpu.pipeline_mode<synchronous>, transform_indices = @transform_2, window_bounds = array<i64: 1, 128>}, {pipeline_mode = #tpu.pipeline_mode<synchronous>, transform_indices = @transform_3, window_bounds = array<i64: 128, 128>}, {transform_indices = @transform_4, window_bounds = array<i64: 128, 128>}]} {
    %c0_i32 = arith.constant 0 : i32
    %0 = arith.cmpi eq, %arg1, %c0_i32 : i32
    %1 = arith.extui %0 : i1 to i32
    %c0_i32_0 = arith.constant 0 : i32
    %2 = arith.cmpi ne, %1, %c0_i32_0 : i32
    scf.if %2 {
      %cst_8 = arith.constant 0.000000e+00 : f32
      %15 = vector.broadcast %cst_8 : f32 to vector<128x128xf32>
      %c0_9 = arith.constant 0 : index
      %c0_10 = arith.constant 0 : index
      %16 = vector.load %arg7[%c0_9, %c0_10] : memref<128x128xf32, #tpu.memory_space<vmem>>, vector<128x128xf32>
      tpu.vector_store %arg7[%c0_9, %c0_10], %15 {strides = array<i32>} : memref<128x128xf32, #tpu.memory_space<vmem>>, vector<128x128xf32>,
    } else {
    }
    %c128_i32 = arith.constant 128 : i32
    %3 = arith.muli %arg1, %c128_i32 : i32
    %4 = tpu.assume_multiple %3, 128 : i32
    %c0 = arith.constant 0 : index
    %c0_1 = arith.constant 0 : index
    %5 = vector.load %arg7[%c0, %c0_1] : memref<128x128xf32, #tpu.memory_space<vmem>>, vector<128x128xf32>
    %c0_2 = arith.constant 0 : index
    %c0_3 = arith.constant 0 : index
    %6 = vector.load %arg2[%c0_2, %c0_3] : memref<128x128xf32, #tpu.memory_space<vmem>>, vector<128x128xf32>
    %7 = arith.index_cast %4 : i32 to index
    %c0_4 = arith.constant 0 : index
    %8 = vector.load %arg3[%7, %c0_4] : memref<384x128xf32, #tpu.memory_space<vmem>>, vector<128x128xf32>
    %cst = arith.constant dense<0.000000e+00> : vector<128x128xf32>
    %9 = tpu.matmul %6, %8, %cst {dimension_numbers = #tpu.dot_dimension_numbers<[1], [0], [0], [1], [0, 0, 1, 1], [], []>} : vector<128x128xf32>, vector<128x128xf32>, vector<128x128xf32> -> vector<128x128xf32>
    %10 = arith.addf %5, %9 : vector<128x128xf32>
    %c0_5 = arith.constant 0 : index
    %c0_6 = arith.constant 0 : index
    %11 = vector.load %arg7[%c0_5, %c0_6] : memref<128x128xf32, #tpu.memory_space<vmem>>, vector<128x128xf32>
    tpu.vector_store %arg7[%c0_5, %c0_6], %10 {strides = array<i32>} : memref<128x128xf32, #tpu.memory_space<vmem>>, vector<128x128xf32>,
    %c2_i32 = arith.constant 2 : i32
    %12 = arith.cmpi eq, %arg1, %c2_i32 : i32
    %13 = arith.extui %12 : i1 to i32
    %c0_i32_7 = arith.constant 0 : i32
    %14 = arith.cmpi ne, %13, %c0_i32_7 : i32
    scf.if %14 {
      %c0_8 = arith.constant 0 : index
      %c0_9 = arith.constant 0 : index
      %15 = vector.load %arg7[%c0_8, %c0_9] : memref<128x128xf32, #tpu.memory_space<vmem>>, vector<128x128xf32>
      %c0_10 = arith.constant 0 : index
      %c0_11 = arith.constant 0 : index
      %16 = vector.load %arg4[%c0_10, %c0_11] : memref<1x128xf32, #tpu.memory_space<vmem>>, vector<1x128xf32>
      %17 = vector.broadcast %16 : vector<1x128xf32> to vector<128x128xf32>
      %18 = arith.addf %15, %17 : vector<128x128xf32>
      %cst_12 = arith.constant 0.000000e+00 : f32
      %19 = vector.broadcast %cst_12 : f32 to vector<128x128xf32>
      %20 = arith.maximumf %18, %19 : vector<128x128xf32>
      %c0_13 = arith.constant 0 : index
      %c0_14 = arith.constant 0 : index
      %21 = vector.load %arg5[%c0_13, %c0_14] : memref<128x128xf32, #tpu.memory_space<vmem>>, vector<128x128xf32>
      %cst_15 = arith.constant dense<0.000000e+00> : vector<128x128xf32>
      %22 = tpu.matmul %20, %21, %cst_15 {dimension_numbers = #tpu.dot_dimension_numbers<[1], [0], [0], [1], [0, 0, 1, 1], [], []>} : vector<128x128xf32>, vector<128x128xf32>, vector<128x128xf32> -> vector<128x128xf32>
      %c0_16 = arith.constant 0 : index
      %c0_17 = arith.constant 0 : index
      %23 = vector.load %arg6[%c0_16, %c0_17] : memref<128x128xf32, #tpu.memory_space<vmem>>, vector<128x128xf32>
      tpu.vector_store %arg6[%c0_16, %c0_17], %22 {strides = array<i32>} : memref<128x128xf32, #tpu.memory_space<vmem>>, vector<128x128xf32>,
    } else {
    }
    return
  }
  func.func @transform_0(%arg0: i32, %arg1: i32) -> (i32, i32) {
    %c0_i32 = arith.constant 0 : i32
    return %arg0, %arg1 : i32, i32
  }
  func.func @transform_1(%arg0: i32, %arg1: i32) -> (i32, i32) {
    %c0_i32 = arith.constant 0 : i32
    %c0_i32_0 = arith.constant 0 : i32
    %c0_i32_1 = arith.constant 0 : i32
    return %c0_i32, %c0_i32_0 : i32, i32
  }
  func.func @transform_2(%arg0: i32, %arg1: i32) -> (i32, i32) {
    %c0_i32 = arith.constant 0 : i32
    %c0_i32_0 = arith.constant 0 : i32
    %c0_i32_1 = arith.constant 0 : i32
    return %c0_i32, %c0_i32_0 : i32, i32
  }
  func.func @transform_3(%arg0: i32, %arg1: i32) -> (i32, i32) {
    %c0_i32 = arith.constant 0 : i32
    %c0_i32_0 = arith.constant 0 : i32
    %c0_i32_1 = arith.constant 0 : i32
    return %c0_i32, %c0_i32_0 : i32, i32
  }
  func.func @transform_4(%arg0: i32, %arg1: i32) -> (i32, i32) {
    %c0_i32 = arith.constant 0 : i32
    %c0_i32_0 = arith.constant 0 : i32
    return %arg0, %c0_i32 : i32, i32
  }
}

module attributes {stable_mosaic.version = 11 : i64} {
  func.func @support_kernel(%arg0: i32, %arg1: memref<128x128xf32, #tpu.memory_space<vmem>>, %arg2: memref<128x128xf32, #tpu.memory_space<vmem>>, %arg3: memref<128x128xf32, #tpu.memory_space<vmem>>) attributes {dimension_semantics = [#tpu.dimension_semantics<parallel>], iteration_bounds = array<i64: 3>, scalar_prefetch = 0 : i64, scratch_operands = 0 : i64, tpu.core_type = #tpu.core_type<tc>, window_params = [{transform_indices = @transform_0, window_bounds = array<i64: 128, 128>}, {pipeline_mode = #tpu.pipeline_mode<synchronous>, transform_indices = @transform_1, window_bounds = array<i64: 128, 128>}, {transform_indices = @transform_2, window_bounds = array<i64: 128, 128>}]} {
    %c0 = arith.constant 0 : index
    %c0_0 = arith.constant 0 : index
    %0 = vector.load %arg1[%c0, %c0_0] : memref<128x128xf32, #tpu.memory_space<vmem>>, vector<128x128xf32>
    %c0_1 = arith.constant 0 : index
    %c0_2 = arith.constant 0 : index
    %1 = vector.load %arg2[%c0_1, %c0_2] : memref<128x128xf32, #tpu.memory_space<vmem>>, vector<128x128xf32>
    %cst = arith.constant dense<0.000000e+00> : vector<128x128xf32>
    %2 = tpu.matmul %0, %1, %cst {dimension_numbers = #tpu.dot_dimension_numbers<[1], [0], [0], [1], [0, 0, 1, 1], [], []>} : vector<128x128xf32>, vector<128x128xf32>, vector<128x128xf32> -> vector<128x128xf32>
    %c0_3 = arith.constant 0 : index
    %c0_4 = arith.constant 0 : index
    %3 = vector.load %arg3[%c0_3, %c0_4] : memref<128x128xf32, #tpu.memory_space<vmem>>, vector<128x128xf32>
    tpu.vector_store %arg3[%c0_3, %c0_4], %2 {strides = array<i32>} : memref<128x128xf32, #tpu.memory_space<vmem>>, vector<128x128xf32>,
    return
  }
  func.func @transform_0(%arg0: i32) -> (i32, i32) {
    %c0_i32 = arith.constant 0 : i32
    %c0_i32_0 = arith.constant 0 : i32
    return %arg0, %c0_i32 : i32, i32
  }
  func.func @transform_1(%arg0: i32) -> (i32, i32) {
    %c0_i32 = arith.constant 0 : i32
    %c0_i32_0 = arith.constant 0 : i32
    %c0_i32_1 = arith.constant 0 : i32
    return %c0_i32, %c0_i32_0 : i32, i32
  }
  func.func @transform_2(%arg0: i32) -> (i32, i32) {
    %c0_i32 = arith.constant 0 : i32
    %c0_i32_0 = arith.constant 0 : i32
    return %arg0, %c0_i32 : i32, i32
  }
}

module attributes {stable_mosaic.version = 11 : i64} {
  func.func @layer2_kernel(%arg0: i32, %arg1: i32, %arg2: memref<128x128xf32, #tpu.memory_space<vmem>>, %arg3: memref<384x128xf32, #tpu.memory_space<vmem>>, %arg4: memref<1x128xf32, #tpu.memory_space<vmem>>, %arg5: memref<128x128xf32, #tpu.memory_space<vmem>>) attributes {dimension_semantics = [#tpu.dimension_semantics<parallel>, #tpu.dimension_semantics<arbitrary>], iteration_bounds = array<i64: 3, 3>, scalar_prefetch = 0 : i64, scratch_operands = 0 : i64, tpu.core_type = #tpu.core_type<tc>, window_params = [{transform_indices = @transform_0, window_bounds = array<i64: 128, 128>}, {pipeline_mode = #tpu.pipeline_mode<synchronous>, transform_indices = @transform_1, window_bounds = array<i64: 384, 128>}, {pipeline_mode = #tpu.pipeline_mode<synchronous>, transform_indices = @transform_2, window_bounds = array<i64: 1, 128>}, {transform_indices = @transform_3, window_bounds = array<i64: 128, 128>}]} {
    %c0_i32 = arith.constant 0 : i32
    %0 = arith.cmpi eq, %arg1, %c0_i32 : i32
    %1 = arith.extui %0 : i1 to i32
    %c0_i32_0 = arith.constant 0 : i32
    %2 = arith.cmpi ne, %1, %c0_i32_0 : i32
    scf.if %2 {
      %c0_7 = arith.constant 0 : index
      %c0_8 = arith.constant 0 : index
      %12 = vector.load %arg4[%c0_7, %c0_8] : memref<1x128xf32, #tpu.memory_space<vmem>>, vector<1x128xf32>
      %13 = vector.shape_cast %12 : vector<1x128xf32> to vector<1x128xf32>
      %14 = vector.broadcast %13 : vector<1x128xf32> to vector<128x128xf32>
      %c0_9 = arith.constant 0 : index
      %c0_10 = arith.constant 0 : index
      %15 = vector.load %arg5[%c0_9, %c0_10] : memref<128x128xf32, #tpu.memory_space<vmem>>, vector<128x128xf32>
      tpu.vector_store %arg5[%c0_9, %c0_10], %14 {strides = array<i32>} : memref<128x128xf32, #tpu.memory_space<vmem>>, vector<128x128xf32>,
    } else {
    }
    %c128_i32 = arith.constant 128 : i32
    %3 = arith.muli %arg1, %c128_i32 : i32
    %4 = tpu.assume_multiple %3, 128 : i32
    %c0 = arith.constant 0 : index
    %c0_1 = arith.constant 0 : index
    %5 = vector.load %arg5[%c0, %c0_1] : memref<128x128xf32, #tpu.memory_space<vmem>>, vector<128x128xf32>
    %c0_2 = arith.constant 0 : index
    %c0_3 = arith.constant 0 : index
    %6 = vector.load %arg2[%c0_2, %c0_3] : memref<128x128xf32, #tpu.memory_space<vmem>>, vector<128x128xf32>
    %7 = arith.index_cast %4 : i32 to index
    %c0_4 = arith.constant 0 : index
    %8 = vector.load %arg3[%7, %c0_4] : memref<384x128xf32, #tpu.memory_space<vmem>>, vector<128x128xf32>
    %cst = arith.constant dense<0.000000e+00> : vector<128x128xf32>
    %9 = tpu.matmul %6, %8, %cst {dimension_numbers = #tpu.dot_dimension_numbers<[1], [0], [0], [1], [0, 0, 1, 1], [], []>} : vector<128x128xf32>, vector<128x128xf32>, vector<128x128xf32> -> vector<128x128xf32>
    %10 = arith.addf %5, %9 : vector<128x128xf32>
    %c0_5 = arith.constant 0 : index
    %c0_6 = arith.constant 0 : index
    %11 = vector.load %arg5[%c0_5, %c0_6] : memref<128x128xf32, #tpu.memory_space<vmem>>, vector<128x128xf32>
    tpu.vector_store %arg5[%c0_5, %c0_6], %10 {strides = array<i32>} : memref<128x128xf32, #tpu.memory_space<vmem>>, vector<128x128xf32>,
    return
  }
  func.func @transform_0(%arg0: i32, %arg1: i32) -> (i32, i32) {
    %c0_i32 = arith.constant 0 : i32
    return %arg0, %arg1 : i32, i32
  }
  func.func @transform_1(%arg0: i32, %arg1: i32) -> (i32, i32) {
    %c0_i32 = arith.constant 0 : i32
    %c0_i32_0 = arith.constant 0 : i32
    %c0_i32_1 = arith.constant 0 : i32
    return %c0_i32, %c0_i32_0 : i32, i32
  }
  func.func @transform_2(%arg0: i32, %arg1: i32) -> (i32, i32) {
    %c0_i32 = arith.constant 0 : i32
    %c0_i32_0 = arith.constant 0 : i32
    %c0_i32_1 = arith.constant 0 : i32
    return %c0_i32, %c0_i32_0 : i32, i32
  }
  func.func @transform_3(%arg0: i32, %arg1: i32) -> (i32, i32) {
    %c0_i32 = arith.constant 0 : i32
    %c0_i32_0 = arith.constant 0 : i32
    return %arg0, %c0_i32 : i32, i32
  }
}

</mosaic_0001>

<bundles_post_ra>
// kernel: tpu_custom_call.1
= control target key start
LH: loop header
LB: loop body
LE: loop exit
PB: predicated region body
PF: predicated region fallthrough
CT: control target
= control target key end

     0   :  { %6 = vsyncpa [#allocation3], 0  ;;  %s114_s0 = inlined_call_operand.hbm [shape: f32[8,128], index: 0, kind: input, shape index: {}]   ;;  %s115_s1 = inlined_call_operand.hbm [shape: f32[8,128], index: 1, kind: output, shape index: {}]  }
   0x1   :  { %7 = vsyncpa [#allocation4], 0  ;;  %s13_s8 = sshll.u32 %s114_s0, 4  ;;  %s96_s9 = smov [#allocation2]   ;;  %s14_s8 = int_to_ptr.hbm [resolvable:$true] %s13_s8 }
   0x2   :  { %s15_s10 = sshll.u32 %s96_s9, 4  ;;  %s16_s10 = int_to_ptr.vmem [resolvable:$true] %s15_s10 }
   0x3   :  { %18 = dma.hbm_to_vmem [thread:$0]  %s14_s8, 128, %s16_s10, [#allocation3]  }
   0x4   :  { %92 = dma.done.wait [#allocation3], 128  }
   0x5   :  { %93 = vsyncadd [#allocation3], 4294967168  ;;  %s97_s11 = smov [#allocation5]   ;;  %s32_s15 = sshll.u32 %s115_s1, 4  ;;  %v23_v0 = vld [vmem:[#allocation2] sm:$0xff]  ;;  %s33_s15 = int_to_ptr.hbm [resolvable:$true] %s32_s15 }
   0x6   :  { %s30_s12 = sshll.u32 %s97_s11, 4  ;;  %24 = vst [vmem:[#allocation5] sm:$0xff] %v23_v0  ;;  %s31_s12 = int_to_ptr.vmem [resolvable:$true] %s30_s12 }
   0x7   :  { %35 = dma.vmem_to_hbm [thread:$0]  %s31_s12, 128, %s33_s15, [#allocation4]  }
   0x8   :  { %94 = dma.done.wait [#allocation4], 128  }
   0x9   :  { %95 = vsyncadd [#allocation4], 4294967168 }
   0xa   :  { %40 = vsyncpa [#allocation3], 1 }
   0xb   :  { %41 = vsyncpa [#allocation4], 1 }

// kernel: _gcn_forward_impl.3
= control target key start
LH: loop header
LB: loop body
LE: loop exit
PB: predicated region body
PF: predicated region fallthrough
CT: control target
= control target key end

     0   :  { %s406_s9 = smov 0   ;;  %s516_s0 = inlined_call_operand.vmem [shape: f32[384,128], index: 0, kind: input, shape index: {}]   ;;  %s517_s1 = inlined_call_operand.vmem [shape: f32[128,128], index: 1, kind: input, shape index: {}]   ;;  %s518_s2 = inlined_call_operand.vmem [shape: f32[384,128], index: 2, kind: output, shape index: {}]  }
   0x1 LB: > { %s316_s10 = sadd.s32 4294967295, %s389_s9   ;;  %p320_p0 = scmp.ge.s32.totalorder %s389_s9, 1  ;;  %s389_s9 = sphi %s406_s9, %s12_s9  }
   0x2   : > { %p113_p1 = scmp.lt.s32.totalorder %s389_s9, 4 }
   0x4   : > { %p114_p2 = pnand %p320_p0, %p113_p1 }
   0x5   : > { %s321_s27 = sshll.u32 (!%p114_p2), %s316_s10, 4 }
   0x6   : > { %117 = sbr.rel (%p114_p2) target bundleno = 201 (0xc9), region = 28  ;;  %p136_p3 = scmp.lt.s32.totalorder (!%p114_p2), %s321_s27, 47 }
   0xb   : > { %v178_v0 = vld [vmem:[%s517_s1 + $0x78] sm:$0xff]  ;;  %v177_v1 = vld [vmem:[%s517_s1 + $0x70] sm:$0xff]  ;;  %v176_v2 = vld [vmem:[%s517_s1 + $0x68] sm:$0xff]  ;;  %s520_s27 = smov (!%p136_p3, %s321_s27), 47 }
   0xc   : > { %328 = vmatpush.msra.mxu2 %v178_v0  ;;  %329 = vmatpush.msra.mxu3 %v178_v0  ;;  %v175_v3 = vld [vmem:[%s517_s1 + $0x60] sm:$0xff]  ;;  %v174_v4 = vld [vmem:[%s517_s1 + $0x58] sm:$0xff]  ;;  %v173_v5 = vld [vmem:[%s517_s1 + $0x50] sm:$0xff]  ;;  %s322_s11 = sshll.u32 %s520_s27, 3 }
   0xd   : > { %179 = vmatpush.msra.mxu0 %v178_v0  ;;  %327 = vmatpush.msra.mxu1 %v178_v0  ;;  %v172_v6 = vld [vmem:[%s517_s1 + $0x48] sm:$0xff]  ;;  %v171_v7 = vld [vmem:[%s517_s1 + $0x40] sm:$0xff]  ;;  %v170_v8 = vld [vmem:[%s517_s1 + $0x38] sm:$0xff]  ;;  %s469_s18 = scalar_lea.vmem %s516_s0, %s322_s11  ;;  %s495_s23 = scalar_lea.vmem %s518_s2, %s322_s11 }
   0xe   : > { %331 = vmatpush.msra.mxu2 %v177_v1  ;;  %332 = vmatpush.msra.mxu3 %v177_v1  ;;  %v169_v9 = vld [vmem:[%s517_s1 + $0x30] sm:$0xff]  ;;  %v168_v10 = vld [vmem:[%s517_s1 + $0x28] sm:$0xff]  ;;  %v167_v11 = vld [vmem:[%s517_s1 + $0x20] sm:$0xff] }
   0xf   : > { %180 = vmatpush.msra.mxu0 %v177_v1  ;;  %330 = vmatpush.msra.mxu1 %v177_v1  ;;  %v166_v12 = vld [vmem:[%s517_s1 + $0x18] sm:$0xff]  ;;  %v165_v13 = vld [vmem:[%s517_s1 + $0x10] sm:$0xff]  ;;  %v164_v14 = vld [vmem:[%s517_s1 + $0x8] sm:$0xff] }
  0x10   : > { %334 = vmatpush.msra.mxu2 %v176_v2  ;;  %335 = vmatpush.msra.mxu3 %v176_v2  ;;  %v163_v15 = vld [vmem:[%s517_s1] sm:$0xff]  ;;  %v156_v20 = vld [vmem:[%s469_s18 + $0x48] sm:$0xff]  ;;  %v157_v24 = vld [vmem:[%s469_s18 + $0x50] sm:$0xff] }
  0x11   : > { %181 = vmatpush.msra.mxu0 %v176_v2  ;;  %333 = vmatpush.msra.mxu1 %v176_v2  ;;  %v155_v16 = vld [vmem:[%s469_s18 + $0x40] sm:$0xff]  ;;  %v160_v21 = vld [vmem:[%s469_s18 + $0x68] sm:$0xff]  ;;  %v161_v25 = vld [vmem:[%s469_s18 + $0x70] sm:$0xff] }
  0x12   : > { %337 = vmatpush.msra.mxu2 %v175_v3  ;;  %338 = vmatpush.msra.mxu3 %v175_v3  ;;  %v159_v17 = vld [vmem:[%s469_s18 + $0x60] sm:$0xff]  ;;  %v148_v22 = vld [vmem:[%s469_s18 + $0x8] sm:$0xff]  ;;  %v149_v26 = vld [vmem:[%s469_s18 + $0x10] sm:$0xff] }
  0x13   : > { %182 = vmatpush.msra.mxu0 %v175_v3  ;;  %336 = vmatpush.msra.mxu1 %v175_v3  ;;  %v147_v18 = vld [vmem:[%s469_s18] sm:$0xff]  ;;  %v152_v23 = vld [vmem:[%s469_s18 + $0x28] sm:$0xff]  ;;  %v153_v27 = vld [vmem:[%s469_s18 + $0x30] sm:$0xff] }
  0x14   : > { %340 = vmatpush.msra.mxu2 %v174_v4  ;;  %341 = vmatpush.msra.mxu3 %v174_v4  ;;  %v151_v19 = vld [vmem:[%s469_s18 + $0x20] sm:$0xff]  ;;  %v158_v28 = vld [vmem:[%s469_s18 + $0x58] sm:$0xff] }
  0x15   : > { %183 = vmatpush.msra.mxu0 %v174_v4  ;;  %339 = vmatpush.msra.mxu1 %v174_v4  ;;  %v162_v29 = vld [vmem:[%s469_s18 + $0x78] sm:$0xff] }
  0x16   : > { %343 = vmatpush.msra.mxu2 %v173_v5  ;;  %344 = vmatpush.msra.mxu3 %v173_v5  ;;  %v150_v30 = vld [vmem:[%s469_s18 + $0x18] sm:$0xff] }
  0x17   : > { %184 = vmatpush.msra.mxu0 %v173_v5  ;;  %342 = vmatpush.msra.mxu1 %v173_v5  ;;  %v154_v31 = vld [vmem:[%s469_s18 + $0x38] sm:$0xff] }
  0x18   : > { %346 = vmatpush.msra.mxu2 %v172_v6  ;;  %347 = vmatpush.msra.mxu3 %v172_v6 }
  0x19   : > { %185 = vmatpush.msra.mxu0 %v172_v6  ;;  %345 = vmatpush.msra.mxu1 %v172_v6 }
  0x1a   : > { %349 = vmatpush.msra.mxu2 %v171_v7  ;;  %350 = vmatpush.msra.mxu3 %v171_v7 }
  0x1b   : > { %186 = vmatpush.msra.mxu0 %v171_v7  ;;  %348 = vmatpush.msra.mxu1 %v171_v7 }
  0x1c   : > { %352 = vmatpush.msra.mxu2 %v170_v8  ;;  %353 = vmatpush.msra.mxu3 %v170_v8 }
  0x1d   : > { %187 = vmatpush.msra.mxu0 %v170_v8  ;;  %351 = vmatpush.msra.mxu1 %v170_v8 }
  0x1e   : > { %355 = vmatpush.msra.mxu2 %v169_v9  ;;  %356 = vmatpush.msra.mxu3 %v169_v9 }
  0x1f   : > { %188 = vmatpush.msra.mxu0 %v169_v9  ;;  %354 = vmatpush.msra.mxu1 %v169_v9 }
  0x20   : > { %358 = vmatpush.msra.mxu2 %v168_v10  ;;  %359 = vmatpush.msra.mxu3 %v168_v10 }
  0x21   : > { %189 = vmatpush.msra.mxu0 %v168_v10  ;;  %357 = vmatpush.msra.mxu1 %v168_v10 }
  0x22   : > { %361 = vmatpush.msra.mxu2 %v167_v11  ;;  %362 = vmatpush.msra.mxu3 %v167_v11 }
  0x23   : > { %190 = vmatpush.msra.mxu0 %v167_v11  ;;  %360 = vmatpush.msra.mxu1 %v167_v11 }
  0x24   : > { %364 = vmatpush.msra.mxu2 %v166_v12  ;;  %365 = vmatpush.msra.mxu3 %v166_v12 }
  0x25   : > { %191 = vmatpush.msra.mxu0 %v166_v12  ;;  %363 = vmatpush.msra.mxu1 %v166_v12 }
  0x26   : > { %367 = vmatpush.msra.mxu2 %v165_v13  ;;  %368 = vmatpush.msra.mxu3 %v165_v13 }
  0x27   : > { %192 = vmatpush.msra.mxu0 %v165_v13  ;;  %366 = vmatpush.msra.mxu1 %v165_v13 }
  0x28   : > { %370 = vmatpush.msra.mxu2 %v164_v14  ;;  %371 = vmatpush.msra.mxu3 %v164_v14 }
  0x29   : > { %193 = vmatpush.msra.mxu0 %v164_v14  ;;  %369 = vmatpush.msra.mxu1 %v164_v14 }
  0x2a   : > { %373 = vmatpush.msra.mxu2 %v163_v15  ;;  %374 = vmatpush.msra.mxu3 %v163_v15 }
  0x2b   : > { %219 = vmatmul.f32.vlgmr.msra.gmra.mxu2 %v155_v16  ;;  %231 = vmatmul.f32.vlgmr.msra.gmra.mxu3 %v159_v17 }
  0x2c   : > { %194 = vmatpush.msra.mxu0 %v163_v15  ;;  %372 = vmatpush.msra.mxu1 %v163_v15 }
  0x2d   : > { %195 = vmatmul.f32.vlgmr.msra.gmra.mxu0 %v147_v18  ;;  %207 = vmatmul.f32.vlgmr.msra.gmra.mxu1 %v151_v19 }
  0x33   : > { %222 = vmatmul.f32.gmra.mxu2 %v156_v20  ;;  %234 = vmatmul.f32.gmra.mxu3 %v160_v21 }
  0x35   : > { %198 = vmatmul.f32.gmra.mxu0 %v148_v22  ;;  %210 = vmatmul.f32.gmra.mxu1 %v152_v23 }
  0x3b   : > { %225 = vmatmul.f32.gmra.mxu2 %v157_v24  ;;  %237 = vmatmul.f32.gmra.mxu3 %v161_v25 }
  0x3d   : > { %201 = vmatmul.f32.gmra.mxu0 %v149_v26  ;;  %213 = vmatmul.f32.gmra.mxu1 %v153_v27 }
  0x43   : > { %228 = vmatmul.f32.gmra.mxu2 %v158_v28  ;;  %240 = vmatmul.f32.gmra.mxu3 %v162_v29 }
  0x45   : > { %204 = vmatmul.f32.gmra.mxu0 %v150_v30  ;;  %216 = vmatmul.f32.gmra.mxu1 %v154_v31 }
  0xaa   : > { %v196_v32 = vpop.f32.mrf.mxu0  ;;  %v208_v33 = vpop.f32.mrf.mxu1 }
  0xab   : > { %244 = vst [vmem:[%s495_s23] sm:$0xff] %v196_v32 }
  0xac   : > { %248 = vst [vmem:[%s495_s23 + $0x20] sm:$0xff] %v208_v33 }
  0xae   : > { %v220_v34 = vpop.f32.mrf.mxu2  ;;  %v232_v35 = vpop.f32.mrf.mxu3 }
  0xaf   : > { %252 = vst [vmem:[%s495_s23 + $0x40] sm:$0xff] %v220_v34 }
  0xb0   : > { %256 = vst [vmem:[%s495_s23 + $0x60] sm:$0xff] %v232_v35 }
  0xb2   : > { %v199_v36 = vpop.f32.mrf.mxu0  ;;  %v211_v37 = vpop.f32.mrf.mxu1 }
  0xb3   : > { %245 = vst [vmem:[%s495_s23 + $0x8] sm:$0xff] %v199_v36 }
  0xb4   : > { %249 = vst [vmem:[%s495_s23 + $0x28] sm:$0xff] %v211_v37 }
  0xb6   : > { %v223_v38 = vpop.f32.mrf.mxu2  ;;  %v235_v39 = vpop.f32.mrf.mxu3 }
  0xb7   : > { %253 = vst [vmem:[%s495_s23 + $0x48] sm:$0xff] %v223_v38 }
  0xb8   : > { %257 = vst [vmem:[%s495_s23 + $0x68] sm:$0xff] %v235_v39 }
  0xba   : > { %v202_v40 = vpop.f32.mrf.mxu0  ;;  %v214_v41 = vpop.f32.mrf.mxu1 }
  0xbb   : > { %246 = vst [vmem:[%s495_s23 + $0x10] sm:$0xff] %v202_v40 }
  0xbc   : > { %250 = vst [vmem:[%s495_s23 + $0x30] sm:$0xff] %v214_v41 }
  0xbe   : > { %v226_v42 = vpop.f32.mrf.mxu2  ;;  %v238_v43 = vpop.f32.mrf.mxu3 }
  0xbf   : > { %254 = vst [vmem:[%s495_s23 + $0x50] sm:$0xff] %v226_v42 }
  0xc0   : > { %258 = vst [vmem:[%s495_s23 + $0x70] sm:$0xff] %v238_v43 }
  0xc2   : > { %v205_v44 = vpop.f32.mrf.mxu0  ;;  %v217_v45 = vpop.f32.mrf.mxu1 }
  0xc3   : > { %247 = vst [vmem:[%s495_s23 + $0x18] sm:$0xff] %v205_v44 }
  0xc4   : > { %251 = vst [vmem:[%s495_s23 + $0x38] sm:$0xff] %v217_v45 }
  0xc6   : > { %v229_v46 = vpop.f32.mrf.mxu2  ;;  %v241_v47 = vpop.f32.mrf.mxu3 }
  0xc7   : > { %255 = vst [vmem:[%s495_s23 + $0x58] sm:$0xff] %v229_v46 }
  0xc8   : > { %259 = vst [vmem:[%s495_s23 + $0x78] sm:$0xff] %v241_v47 }
  0xc9 PF: > { %s12_s9 = sadd.s32 1, %s389_s9  }
  0xca   : > { %p9_p4 = scmp.ge.s32.totalorder %s12_s9, 5  }
  0xcc   :  { %11 = sbr.rel (!%p9_p4) target bundleno = 1 (0x1), region = 58 }

// kernel: _gcn_forward_impl.4
= control target key start
LH: loop header
LB: loop body
LE: loop exit
PB: predicated region body
PF: predicated region fallthrough
CT: control target
= control target key end

     0   :  { %s964_s15 = smov 0   ;;  %s966_s16 = smov 0   ;;  %s1199_s0 = inlined_call_operand.vmem [shape: f32[384,384], index: 0, kind: input, shape index: {}]   ;;  %s1200_s1 = inlined_call_operand.vmem [shape: f32[384,128], index: 1, kind: input, shape index: {}]   ;;  %s1201_s2 = inlined_call_operand.vmem [shape: f32[1,128], index: 2, kind: input, shape index: {}]   ;;  %s1202_s3 = inlined_call_operand.vmem [shape: f32[128,128], index: 3, kind: input, shape index: {}]   ;;  %s1203_s4 = inlined_call_operand.vmem [shape: f32[384,128], index: 4, kind: output, shape index: {}]  }
   0x1   :  { %s968_s17 = smov 0   ;;  %s970_s18 = smov 0  }
   0x2   :  { %s972_s19 = smov 0   ;;  %s974_s20 = smov 0  }
   0x3   :  { %s976_s21 = smov 0  }
   0x4 LB: > { %s23_s22 = sadd.s32 1, %s928_s19  ;;  %s26_s23 = sadd.s32 1, %s932_s20  ;;  %s936_s21 = sphi %s976_s21, %s14_s21   ;;  %s932_s20 = sphi %s974_s20, %s1209_s20   ;;  %s928_s19 = sphi %s972_s19, %s1208_s19   ;;  %s924_s18 = sphi %s970_s18, %s1207_s18   ;;  %s920_s17 = sphi %s968_s17, %s1206_s17   ;;  %s916_s16 = sphi %s966_s16, %s1205_s16   ;;  %s912_s15 = sphi %s964_s15, %s1204_s15  }
   0x5   : > { %p24_p0 = scmp.ge.s32.totalorder %s23_s22, 3  ;;  %p42_p1 = scmp.ne.s32.totalorder %s916_s16, %s912_s15 }
   0x6   : > { %p43_p2 = scmp.eq.s32.totalorder %s936_s21, 0  ;;  %s35_s27 = sadd.s32 1, %s916_s16 }
   0x7   : > { %s1211_s22 = smov (%p24_p0, %s23_s22), 0  ;;  %s1213_s23 = smov (!%p24_p0, %s26_s23), %s932_s20 }
   0x8   : > { %p44_p3 = por %p43_p2, %p42_p1  ;;  %p28_p4 = scmp.ge.s32.totalorder %s1213_s23, 3 }
   0x9   : > { %s31_s24 = ssub.s32 %s928_s19, %s1211_s22  ;;  %p713_p6 = scmp.ge.s32.totalorder %s936_s21, 9 }
   0xa   : > { %s1215_s23 = smov (%p28_p4, %s1213_s23), 0 }
   0xb   : > { %s30_s25 = ssub.s32 %s932_s20, %s1215_s23  ;;  %166 = sbr.rel (%p713_p6) target bundleno = 39 (0x27), region = 28 }
   0xc   : > { %s32_s26 = sor.u32 %s31_s24, %s30_s25 }
   0xd   : > { %p33_p5 = scmp.eq.s32.totalorder %s32_s26, 0 }
   0xf   : > { %s1015_s28 = scalar_select %p33_p5, %s916_s16, %s35_s27  }
  0x10   : > { %169 = sbr.rel (!%p44_p3) target bundleno = 39 (0x27), region = 32  ;;  %s171_s29 = sand.u32 (%p44_p3), 1, %s916_s16  }
  0x11   : > { %s823_s30 = smul.u32 (%p44_p3), 48, %s932_s20  ;;  %s714_s5 = sshll.u32 (%p44_p3), %s171_s29, 7 }
  0x12   : > { %s173_s11 = scalar_lea.vmem (%p44_p3), [#allocation3], %s714_s5 }
  0x13   : > { %s176_s6 = sadd.s32 (%p44_p3), %s928_s19, %s823_s30 }
  0x14   : > { %s717_s7 = sshll.u32 (%p44_p3), %s176_s6, 3 }
  0x15   : > { %s1024_s10 = scalar_lea.vmem %s1199_s0, %s717_s7 }
  0x16   : > { %v237_v0 = vld [vmem:[%s1024_s10] sm:$0xff]  ;;  %v239_v1 = vld [vmem:[%s1024_s10 + $0x18] sm:$0xff]  ;;  %v241_v2 = vld [vmem:[%s1024_s10 + $0x30] sm:$0xff] }
  0x17   : > { %238 = vst [vmem:[%s173_s11] sm:$0xff] %v237_v0  ;;  %v243_v3 = vld [vmem:[%s1024_s10 + $0x48] sm:$0xff]  ;;  %v245_v4 = vld [vmem:[%s1024_s10 + $0x60] sm:$0xff]  ;;  %v247_v5 = vld [vmem:[%s1024_s10 + $0x78] sm:$0xff] }
  0x18   : > { %240 = vst [vmem:[%s173_s11 + $0x8] sm:$0xff] %v239_v1  ;;  %v249_v6 = vld [vmem:[%s1024_s10 + $0x90] sm:$0xff]  ;;  %v251_v7 = vld [vmem:[%s1024_s10 + $0xa8] sm:$0xff]  ;;  %v253_v8 = vld [vmem:[%s1024_s10 + $0xc0] sm:$0xff] }
  0x19   : > { %242 = vst [vmem:[%s173_s11 + $0x10] sm:$0xff] %v241_v2  ;;  %v255_v9 = vld [vmem:[%s1024_s10 + $0xd8] sm:$0xff]  ;;  %v257_v10 = vld [vmem:[%s1024_s10 + $0xf0] sm:$0xff]  ;;  %v259_v11 = vld [vmem:[%s1024_s10 + $0x108] sm:$0xff] }
  0x1a   : > { %244 = vst [vmem:[%s173_s11 + $0x18] sm:$0xff] %v243_v3  ;;  %v261_v12 = vld [vmem:[%s1024_s10 + $0x120] sm:$0xff]  ;;  %v263_v13 = vld [vmem:[%s1024_s10 + $0x138] sm:$0xff]  ;;  %v265_v14 = vld [vmem:[%s1024_s10 + $0x150] sm:$0xff] }
  0x1b   : > { %246 = vst [vmem:[%s173_s11 + $0x20] sm:$0xff] %v245_v4  ;;  %v267_v15 = vld [vmem:[%s1024_s10 + $0x168] sm:$0xff] }
  0x1c   : > { %248 = vst [vmem:[%s173_s11 + $0x28] sm:$0xff] %v247_v5 }
  0x1d   : > { %250 = vst [vmem:[%s173_s11 + $0x30] sm:$0xff] %v249_v6 }
  0x1e   : > { %252 = vst [vmem:[%s173_s11 + $0x38] sm:$0xff] %v251_v7 }
  0x1f   : > { %254 = vst [vmem:[%s173_s11 + $0x40] sm:$0xff] %v253_v8 }
  0x20   : > { %256 = vst [vmem:[%s173_s11 + $0x48] sm:$0xff] %v255_v9 }
  0x21   : > { %258 = vst [vmem:[%s173_s11 + $0x50] sm:$0xff] %v257_v10 }
  0x22   : > { %260 = vst [vmem:[%s173_s11 + $0x58] sm:$0xff] %v259_v11 }
  0x23   : > { %262 = vst [vmem:[%s173_s11 + $0x60] sm:$0xff] %v261_v12 }
  0x24   : > { %264 = vst [vmem:[%s173_s11 + $0x68] sm:$0xff] %v263_v13 }
  0x25   : > { %266 = vst [vmem:[%s173_s11 + $0x70] sm:$0xff] %v265_v14 }
  0x26   : > { %268 = vst [vmem:[%s173_s11 + $0x78] sm:$0xff] %v267_v15 }
  0x27 PF: > { %p718_p7 = scmp.ge.s32.totalorder %s936_s21, 1  ;;  %p273_p8 = scmp.lt.s32.totalorder %s936_s21, 10 }
  0x29   : > { %p274_p9 = pnand %p718_p7, %p273_p8 }
  0x2a   : > { %s280_s12 = sand.u32 (!%p274_p9), 1, %s912_s15   ;;  %s720_s13 = sshll.u32 (!%p274_p9), %s924_s18, 4 }
  0x2b   : > { %277 = sbr.rel (%p274_p9) target bundleno = 454 (0x1c6), region = 70  ;;  %s719_s14 = sshll.u32 (!%p274_p9), %s280_s12, 7 }
  0x2c   : > { %p307_p10 = scmp.lt.s32.totalorder (!%p274_p9), %s720_s13, 47  ;;  %s1051_s29 = scalar_lea.vmem (!%p274_p9), [#allocation3], %s719_s14 }
  0x2d   : > { %p722_p11 = scmp.ne.s32.totalorder (!%p274_p9), %s920_s17, 0 }
  0x30   : > { %s1217_s13 = smov (!%p307_p10, %s720_s13), 47  ;;  %315 = sbr.rel (%p722_p11) target bundleno = 70 (0x46), region = 78 }
  0x31   : > { %s721_s24 = sshll.u32 %s1217_s13, 3 }
  0x32   : > { %s1049_s27 = scalar_lea.vmem %s1203_s4, %s721_s24 }
  0x35   : > { %v938_v16 = vmov 0.0  }
  0x36   : > { %316 = vst [vmem:[#allocation2 + $0x30] sm:$0xff] %v938_v16 }
  0x37   : > { %317 = vst [vmem:[#allocation2] sm:$0xff] %v938_v16 }
  0x38   : > { %318 = vst [vmem:[#allocation2 + $0x58] sm:$0xff] %v938_v16 }
  0x39   : > { %319 = vst [vmem:[#allocation2 + $0x18] sm:$0xff] %v938_v16 }
  0x3a   : > { %320 = vst [vmem:[#allocation2 + $0x50] sm:$0xff] %v938_v16 }
  0x3b   : > { %321 = vst [vmem:[#allocation2 + $0x68] sm:$0xff] %v938_v16 }
  0x3c   : > { %322 = vst [vmem:[#allocation2 + $0x8] sm:$0xff] %v938_v16 }
  0x3d   : > { %323 = vst [vmem:[#allocation2 + $0x48] sm:$0xff] %v938_v16 }
  0x3e   : > { %324 = vst [vmem:[#allocation2 + $0x40] sm:$0xff] %v938_v16 }
  0x3f   : > { %325 = vst [vmem:[#allocation2 + $0x20] sm:$0xff] %v938_v16 }
  0x40   : > { %326 = vst [vmem:[#allocation2 + $0x10] sm:$0xff] %v938_v16 }
  0x41   : > { %327 = vst [vmem:[#allocation2 + $0x38] sm:$0xff] %v938_v16 }
  0x42   : > { %328 = vst [vmem:[#allocation2 + $0x60] sm:$0xff] %v938_v16 }
  0x43   : > { %329 = vst [vmem:[#allocation2 + $0x70] sm:$0xff] %v938_v16 }
  0x44   : > { %330 = vst [vmem:[#allocation2 + $0x78] sm:$0xff] %v938_v16 }
  0x45   : > { %331 = vst [vmem:[#allocation2 + $0x28] sm:$0xff] %v938_v16 }
  0x46 PF: > { %s723_s15 = sshll.u32 %s920_s17, 7  ;;  %v357_v33 = vld [vmem:[%s1051_s29 + $0x40] sm:$0xff]  ;;  %v358_v37 = vld [vmem:[%s1051_s29 + $0x48] sm:$0xff]  ;;  %v359_v41 = vld [vmem:[%s1051_s29 + $0x50] sm:$0xff]  ;;  %p724_p12 = scmp.ne.s32.totalorder %s920_s17, 2 }
  0x47   : > { %s1058_s5 = scalar_lea.vmem %s1200_s1, %s723_s15  ;;  %v361_v34 = vld [vmem:[%s1051_s29 + $0x60] sm:$0xff]  ;;  %v362_v38 = vld [vmem:[%s1051_s29 + $0x68] sm:$0xff]  ;;  %v363_v42 = vld [vmem:[%s1051_s29 + $0x70] sm:$0xff] }
  0x48   : > { %v381_v17 = vld [vmem:[%s1058_s5 + $0x78] sm:$0xff]  ;;  %v380_v18 = vld [vmem:[%s1058_s5 + $0x70] sm:$0xff]  ;;  %v379_v19 = vld [vmem:[%s1058_s5 + $0x68] sm:$0xff] }
  0x49   : > { %728 = vmatpush.msra.mxu2 %v381_v17  ;;  %729 = vmatpush.msra.mxu3 %v381_v17  ;;  %v378_v20 = vld [vmem:[%s1058_s5 + $0x60] sm:$0xff]  ;;  %v377_v21 = vld [vmem:[%s1058_s5 + $0x58] sm:$0xff]  ;;  %v376_v22 = vld [vmem:[%s1058_s5 + $0x50] sm:$0xff] }
  0x4a   : > { %382 = vmatpush.msra.mxu0 %v381_v17  ;;  %727 = vmatpush.msra.mxu1 %v381_v17  ;;  %v375_v23 = vld [vmem:[%s1058_s5 + $0x48] sm:$0xff]  ;;  %v374_v24 = vld [vmem:[%s1058_s5 + $0x40] sm:$0xff]  ;;  %v373_v25 = vld [vmem:[%s1058_s5 + $0x38] sm:$0xff] }
  0x4b   : > { %731 = vmatpush.msra.mxu2 %v380_v18  ;;  %732 = vmatpush.msra.mxu3 %v380_v18  ;;  %v372_v26 = vld [vmem:[%s1058_s5 + $0x30] sm:$0xff]  ;;  %v371_v27 = vld [vmem:[%s1058_s5 + $0x28] sm:$0xff]  ;;  %v370_v28 = vld [vmem:[%s1058_s5 + $0x20] sm:$0xff] }
  0x4c   : > { %383 = vmatpush.msra.mxu0 %v380_v18  ;;  %730 = vmatpush.msra.mxu1 %v380_v18  ;;  %v369_v29 = vld [vmem:[%s1058_s5 + $0x18] sm:$0xff]  ;;  %v368_v30 = vld [vmem:[%s1058_s5 + $0x10] sm:$0xff]  ;;  %v367_v31 = vld [vmem:[%s1058_s5 + $0x8] sm:$0xff] }
  0x4d   : > { %734 = vmatpush.msra.mxu2 %v379_v19  ;;  %735 = vmatpush.msra.mxu3 %v379_v19  ;;  %v366_v32 = vld [vmem:[%s1058_s5] sm:$0xff]  ;;  %v350_v39 = vld [vmem:[%s1051_s29 + $0x8] sm:$0xff]  ;;  %v351_v43 = vld [vmem:[%s1051_s29 + $0x10] sm:$0xff] }
  0x4e   : > { %384 = vmatpush.msra.mxu0 %v379_v19  ;;  %733 = vmatpush.msra.mxu1 %v379_v19  ;;  %v349_v35 = vld [vmem:[%s1051_s29] sm:$0xff]  ;;  %v354_v40 = vld [vmem:[%s1051_s29 + $0x28] sm:$0xff]  ;;  %v355_v44 = vld [vmem:[%s1051_s29 + $0x30] sm:$0xff] }
  0x4f   : > { %737 = vmatpush.msra.mxu2 %v378_v20  ;;  %738 = vmatpush.msra.mxu3 %v378_v20  ;;  %v353_v36 = vld [vmem:[%s1051_s29 + $0x20] sm:$0xff]  ;;  %v360_v45 = vld [vmem:[%s1051_s29 + $0x58] sm:$0xff]  ;;  %v333_v49 = vld [vmem:[#allocation2 + $0x30] sm:$0xff] }
  0x50   : > { %385 = vmatpush.msra.mxu0 %v378_v20  ;;  %736 = vmatpush.msra.mxu1 %v378_v20  ;;  %v364_v46 = vld [vmem:[%s1051_s29 + $0x78] sm:$0xff]  ;;  %v337_v50 = vld [vmem:[#allocation2 + $0x50] sm:$0xff]  ;;  %v341_v55 = vld [vmem:[#allocation2 + $0x40] sm:$0xff] }
  0x51   : > { %740 = vmatpush.msra.mxu2 %v377_v21  ;;  %741 = vmatpush.msra.mxu3 %v377_v21  ;;  %v352_v47 = vld [vmem:[%s1051_s29 + $0x18] sm:$0xff]  ;;  %v345_v56 = vld [vmem:[#allocation2 + $0x60] sm:$0xff]  ;;  %v338_v62 = vld [vmem:[#allocation2 + $0x68] sm:$0xff] }
  0x52   : > { %386 = vmatpush.msra.mxu0 %v377_v21  ;;  %739 = vmatpush.msra.mxu1 %v377_v21  ;;  %v356_v48 = vld [vmem:[%s1051_s29 + $0x38] sm:$0xff]  ;;  %v334_v61 = vld [vmem:[#allocation2] sm:$0xff]  ;;  %v346_v4 = vld [vmem:[#allocation2 + $0x70] sm:$0xff] }
  0x53   : > { %743 = vmatpush.msra.mxu2 %v376_v22  ;;  %744 = vmatpush.msra.mxu3 %v376_v22  ;;  %v342_v3 = vld [vmem:[#allocation2 + $0x20] sm:$0xff]  ;;  %v335_v9 = vld [vmem:[#allocation2 + $0x58] sm:$0xff]  ;;  %v339_v10 = vld [vmem:[#allocation2 + $0x8] sm:$0xff] }
  0x54   : > { %387 = vmatpush.msra.mxu0 %v376_v22  ;;  %742 = vmatpush.msra.mxu1 %v376_v22  ;;  %v343_v15 = vld [vmem:[#allocation2 + $0x10] sm:$0xff]  ;;  %v347_v16 = vld [vmem:[#allocation2 + $0x78] sm:$0xff]  ;;  %v340_v22 = vld [vmem:[#allocation2 + $0x48] sm:$0xff] }
  0x55   : > { %746 = vmatpush.msra.mxu2 %v375_v23  ;;  %747 = vmatpush.msra.mxu3 %v375_v23  ;;  %v336_v21 = vld [vmem:[#allocation2 + $0x18] sm:$0xff] }
  0x56   : > { %388 = vmatpush.msra.mxu0 %v375_v23  ;;  %745 = vmatpush.msra.mxu1 %v375_v23 }
  0x57   : > { %749 = vmatpush.msra.mxu2 %v374_v24  ;;  %750 = vmatpush.msra.mxu3 %v374_v24 }
  0x58   : > { %389 = vmatpush.msra.mxu0 %v374_v24  ;;  %748 = vmatpush.msra.mxu1 %v374_v24 }
  0x59   : > { %752 = vmatpush.msra.mxu2 %v373_v25  ;;  %753 = vmatpush.msra.mxu3 %v373_v25 }
  0x5a   : > { %390 = vmatpush.msra.mxu0 %v373_v25  ;;  %751 = vmatpush.msra.mxu1 %v373_v25 }
  0x5b   : > { %755 = vmatpush.msra.mxu2 %v372_v26  ;;  %756 = vmatpush.msra.mxu3 %v372_v26 }
  0x5c   : > { %391 = vmatpush.msra.mxu0 %v372_v26  ;;  %754 = vmatpush.msra.mxu1 %v372_v26 }
  0x5d   : > { %758 = vmatpush.msra.mxu2 %v371_v27  ;;  %759 = vmatpush.msra.mxu3 %v371_v27 }
  0x5e   : > { %392 = vmatpush.msra.mxu0 %v371_v27  ;;  %757 = vmatpush.msra.mxu1 %v371_v27  ;;  %v344_v27 = vld [vmem:[#allocation2 + $0x38] sm:$0xff] }
  0x5f   : > { %761 = vmatpush.msra.mxu2 %v370_v28  ;;  %762 = vmatpush.msra.mxu3 %v370_v28 }
  0x60   : > { %393 = vmatpush.msra.mxu0 %v370_v28  ;;  %760 = vmatpush.msra.mxu1 %v370_v28  ;;  %v348_v28 = vld [vmem:[#allocation2 + $0x28] sm:$0xff] }
  0x61   : > { %764 = vmatpush.msra.mxu2 %v369_v29  ;;  %765 = vmatpush.msra.mxu3 %v369_v29 }
  0x62   : > { %394 = vmatpush.msra.mxu0 %v369_v29  ;;  %763 = vmatpush.msra.mxu1 %v369_v29 }
  0x63   : > { %767 = vmatpush.msra.mxu2 %v368_v30  ;;  %768 = vmatpush.msra.mxu3 %v368_v30 }
  0x64   : > { %395 = vmatpush.msra.mxu0 %v368_v30  ;;  %766 = vmatpush.msra.mxu1 %v368_v30 }
  0x65   : > { %770 = vmatpush.msra.mxu2 %v367_v31  ;;  %771 = vmatpush.msra.mxu3 %v367_v31 }
  0x66   : > { %396 = vmatpush.msra.mxu0 %v367_v31  ;;  %769 = vmatpush.msra.mxu1 %v367_v31 }
  0x67   : > { %773 = vmatpush.msra.mxu2 %v366_v32  ;;  %774 = vmatpush.msra.mxu3 %v366_v32 }
  0x68   : > { %422 = vmatmul.f32.vlgmr.msra.gmra.mxu2 %v357_v33  ;;  %434 = vmatmul.f32.vlgmr.msra.gmra.mxu3 %v361_v34 }
  0x69   : > { %397 = vmatpush.msra.mxu0 %v366_v32  ;;  %772 = vmatpush.msra.mxu1 %v366_v32 }
  0x6a   : > { %398 = vmatmul.f32.vlgmr.msra.gmra.mxu0 %v349_v35  ;;  %410 = vmatmul.f32.vlgmr.msra.gmra.mxu1 %v353_v36 }
  0x70   : > { %425 = vmatmul.f32.gmra.mxu2 %v358_v37  ;;  %437 = vmatmul.f32.gmra.mxu3 %v362_v38 }
  0x72   : > { %401 = vmatmul.f32.gmra.mxu0 %v350_v39  ;;  %413 = vmatmul.f32.gmra.mxu1 %v354_v40 }
  0x78   : > { %428 = vmatmul.f32.gmra.mxu2 %v359_v41  ;;  %440 = vmatmul.f32.gmra.mxu3 %v363_v42 }
  0x7a   : > { %404 = vmatmul.f32.gmra.mxu0 %v351_v43  ;;  %416 = vmatmul.f32.gmra.mxu1 %v355_v44 }
  0x80   : > { %431 = vmatmul.f32.gmra.mxu2 %v360_v45  ;;  %443 = vmatmul.f32.gmra.mxu3 %v364_v46 }
  0x82   : > { %407 = vmatmul.f32.gmra.mxu0 %v352_v47  ;;  %419 = vmatmul.f32.gmra.mxu1 %v356_v48 }
  0xe7   : > { %v399_v51 = vpop.f32.mrf.mxu0  ;;  %v411_v52 = vpop.f32.mrf.mxu1 }
  0xe8   : > { %v447_v53 = vadd.f32 %v399_v51, %v333_v49  ;;  %v451_v54 = vadd.f32 %v411_v52, %v337_v50 }
  0xea   : > { %463 = vst [vmem:[#allocation2 + $0x30] sm:$0xff] %v447_v53 }
  0xeb   : > { %467 = vst [vmem:[#allocation2 + $0x50] sm:$0xff] %v451_v54  ;;  %v423_v57 = vpop.f32.mrf.mxu2  ;;  %v435_v58 = vpop.f32.mrf.mxu3 }
  0xec   : > { %v455_v59 = vadd.f32 %v423_v57, %v341_v55  ;;  %v459_v60 = vadd.f32 %v435_v58, %v345_v56 }
  0xee   : > { %471 = vst [vmem:[#allocation2 + $0x40] sm:$0xff] %v455_v59 }
  0xef   : > { %475 = vst [vmem:[#allocation2 + $0x60] sm:$0xff] %v459_v60  ;;  %v402_v63 = vpop.f32.mrf.mxu0  ;;  %v414_v0 = vpop.f32.mrf.mxu1 }
  0xf0   : > { %v448_v1 = vadd.f32 %v402_v63, %v334_v61  ;;  %v452_v2 = vadd.f32 %v414_v0, %v338_v62 }
  0xf2   : > { %464 = vst [vmem:[#allocation2] sm:$0xff] %v448_v1 }
  0xf3   : > { %468 = vst [vmem:[#allocation2 + $0x68] sm:$0xff] %v452_v2  ;;  %v426_v5 = vpop.f32.mrf.mxu2  ;;  %v438_v6 = vpop.f32.mrf.mxu3 }
  0xf4   : > { %v456_v7 = vadd.f32 %v426_v5, %v342_v3  ;;  %v460_v8 = vadd.f32 %v438_v6, %v346_v4 }
  0xf6   : > { %472 = vst [vmem:[#allocation2 + $0x20] sm:$0xff] %v456_v7 }
  0xf7   : > { %476 = vst [vmem:[#allocation2 + $0x70] sm:$0xff] %v460_v8  ;;  %v405_v11 = vpop.f32.mrf.mxu0  ;;  %v417_v12 = vpop.f32.mrf.mxu1 }
  0xf8   : > { %v449_v13 = vadd.f32 %v405_v11, %v335_v9  ;;  %v453_v14 = vadd.f32 %v417_v12, %v339_v10 }
  0xfa   : > { %465 = vst [vmem:[#allocation2 + $0x58] sm:$0xff] %v449_v13 }
  0xfb   : > { %469 = vst [vmem:[#allocation2 + $0x8] sm:$0xff] %v453_v14  ;;  %v429_v17 = vpop.f32.mrf.mxu2  ;;  %v441_v18 = vpop.f32.mrf.mxu3 }
  0xfc   : > { %v457_v19 = vadd.f32 %v429_v17, %v343_v15  ;;  %v461_v20 = vadd.f32 %v441_v18, %v347_v16 }
  0xfe   : > { %473 = vst [vmem:[#allocation2 + $0x10] sm:$0xff] %v457_v19 }
  0xff   : > { %477 = vst [vmem:[#allocation2 + $0x78] sm:$0xff] %v461_v20  ;;  %v408_v23 = vpop.f32.mrf.mxu0  ;;  %v420_v24 = vpop.f32.mrf.mxu1 }
 0x100   : > { %v450_v25 = vadd.f32 %v408_v23, %v336_v21  ;;  %v454_v26 = vadd.f32 %v420_v24, %v340_v22 }
 0x102   : > { %466 = vst [vmem:[#allocation2 + $0x18] sm:$0xff] %v450_v25 }
 0x103   : > { %470 = vst [vmem:[#allocation2 + $0x48] sm:$0xff] %v454_v26  ;;  %v432_v29 = vpop.f32.mrf.mxu2  ;;  %v444_v30 = vpop.f32.mrf.mxu3  ;;  %482 = sbr.rel (%p724_p12) target bundleno = 454 (0x1c6), region = 82 }
 0x104   : > { %v458_v31 = vadd.f32 %v432_v29, %v344_v27  ;;  %v462_v32 = vadd.f32 %v444_v30, %v348_v28 }
 0x106   : > { %474 = vst [vmem:[#allocation2 + $0x38] sm:$0xff] %v458_v31 }
 0x107   : > { %478 = vst [vmem:[#allocation2 + $0x28] sm:$0xff] %v462_v32 }
 0x108   : > { %v550_v33 = vld [vmem:[%s1202_s3 + $0x78] sm:$0xff]  ;;  %v549_v34 = vld [vmem:[%s1202_s3 + $0x70] sm:$0xff]  ;;  %v548_v35 = vld [vmem:[%s1202_s3 + $0x68] sm:$0xff] }
 0x109   : > { %776 = vmatpush.msra.mxu2 %v550_v33  ;;  %777 = vmatpush.msra.mxu3 %v550_v33  ;;  %v547_v36 = vld [vmem:[%s1202_s3 + $0x60] sm:$0xff]  ;;  %v546_v37 = vld [vmem:[%s1202_s3 + $0x58] sm:$0xff]  ;;  %v545_v38 = vld [vmem:[%s1202_s3 + $0x50] sm:$0xff] }
 0x10a   : > { %551 = vmatpush.msra.mxu0 %v550_v33  ;;  %775 = vmatpush.msra.mxu1 %v550_v33  ;;  %v544_v39 = vld [vmem:[%s1202_s3 + $0x48] sm:$0xff]  ;;  %v543_v40 = vld [vmem:[%s1202_s3 + $0x40] sm:$0xff]  ;;  %v542_v41 = vld [vmem:[%s1202_s3 + $0x38] sm:$0xff] }
 0x10b   : > { %779 = vmatpush.msra.mxu2 %v549_v34  ;;  %780 = vmatpush.msra.mxu3 %v549_v34  ;;  %v541_v42 = vld [vmem:[%s1202_s3 + $0x30] sm:$0xff]  ;;  %v540_v43 = vld [vmem:[%s1202_s3 + $0x28] sm:$0xff]  ;;  %v539_v44 = vld [vmem:[%s1202_s3 + $0x20] sm:$0xff] }
 0x10c   : > { %552 = vmatpush.msra.mxu0 %v549_v34  ;;  %778 = vmatpush.msra.mxu1 %v549_v34  ;;  %v1132_v45 = vld [vmem:[%s1201_s2] ss:$0 sm:$0xff]  ;;  %v538_v48 = vld [vmem:[%s1202_s3 + $0x18] sm:$0xff]  ;;  %v483_v49 = vld [vmem:[#allocation2 + $0x30] sm:$0xff] }
 0x10d   : > { %782 = vmatpush.msra.mxu2 %v548_v35  ;;  %783 = vmatpush.msra.mxu3 %v548_v35  ;;  %v491_v46 = vld [vmem:[#allocation2 + $0x40] sm:$0xff]  ;;  %v487_v50 = vld [vmem:[#allocation2 + $0x50] sm:$0xff]  ;;  %v536_v54 = vld [vmem:[%s1202_s3 + $0x8] sm:$0xff]  ;;  %v503_v55 = vadd.f32 %v1132_v45, %v483_v49 }
 0x10e   : > { %553 = vmatpush.msra.mxu0 %v548_v35  ;;  %781 = vmatpush.msra.mxu1 %v548_v35  ;;  %v495_v47 = vld [vmem:[#allocation2 + $0x60] sm:$0xff]  ;;  %v537_v51 = vld [vmem:[%s1202_s3 + $0x10] sm:$0xff]  ;;  %v511_v52 = vadd.f32 %v1132_v45, %v491_v46  ;;  %v507_v56 = vadd.f32 %v1132_v45, %v487_v50  ;;  %v488_v1 = vld [vmem:[#allocation2 + $0x68] sm:$0xff] }
 0x10f   : > { %785 = vmatpush.msra.mxu2 %v547_v36  ;;  %786 = vmatpush.msra.mxu3 %v547_v36  ;;  %v515_v53 = vadd.f32 %v1132_v45, %v495_v47  ;;  %v535_v57 = vld [vmem:[%s1202_s3] sm:$0xff]  ;;  %v496_v61 = vld [vmem:[#allocation2 + $0x70] sm:$0xff]  ;;  %v519_v62 = vmax.f32 %v503_v55, 0.0  ;;  %v508_v5 = vadd.f32 %v1132_v45, %v488_v1  ;;  %v497_v9 = vld [vmem:[#allocation2 + $0x78] sm:$0xff] }
 0x110   : > { %554 = vmatpush.msra.mxu0 %v547_v36  ;;  %784 = vmatpush.msra.mxu1 %v547_v36  ;;  %v527_v58 = vmax.f32 %v511_v52, 0.0  ;;  %v492_v60 = vld [vmem:[#allocation2 + $0x20] sm:$0xff]  ;;  %v523_v63 = vmax.f32 %v507_v56, 0.0  ;;  %v516_v3 = vadd.f32 %v1132_v45, %v496_v61  ;;  %v493_v8 = vld [vmem:[#allocation2 + $0x10] sm:$0xff]  ;;  %v485_v12 = vld [vmem:[#allocation2 + $0x58] sm:$0xff]  ;;  %v517_v15 = vadd.f32 %v1132_v45, %v497_v9 }
 0x111   : > { %788 = vmatpush.msra.mxu2 %v546_v37  ;;  %789 = vmatpush.msra.mxu3 %v546_v37  ;;  %v531_v59 = vmax.f32 %v515_v53, 0.0  ;;  %v484_v0 = vld [vmem:[#allocation2] sm:$0xff]  ;;  %v512_v2 = vadd.f32 %v1132_v45, %v492_v60  ;;  %v524_v11 = vmax.f32 %v508_v5, 0.0  ;;  %v489_v13 = vld [vmem:[#allocation2 + $0x8] sm:$0xff]  ;;  %v513_v14 = vadd.f32 %v1132_v45, %v493_v8  ;;  %v494_v20 = vld [vmem:[#allocation2 + $0x38] sm:$0xff] }
 0x112   : > { %555 = vmatpush.msra.mxu0 %v546_v37  ;;  %787 = vmatpush.msra.mxu1 %v546_v37  ;;  %v504_v4 = vadd.f32 %v1132_v45, %v484_v0  ;;  %v532_v7 = vmax.f32 %v516_v3, 0.0  ;;  %v505_v16 = vadd.f32 %v1132_v45, %v485_v12  ;;  %v509_v17 = vadd.f32 %v1132_v45, %v489_v13  ;;  %v498_v21 = vld [vmem:[#allocation2 + $0x28] sm:$0xff]  ;;  %v486_v24 = vld [vmem:[#allocation2 + $0x18] sm:$0xff] }
 0x113   : > { %791 = vmatpush.msra.mxu2 %v545_v38  ;;  %792 = vmatpush.msra.mxu3 %v545_v38  ;;  %v528_v6 = vmax.f32 %v512_v2, 0.0  ;;  %v529_v18 = vmax.f32 %v513_v14, 0.0  ;;  %v533_v19 = vmax.f32 %v517_v15, 0.0  ;;  %v490_v25 = vld [vmem:[#allocation2 + $0x48] sm:$0xff]  ;;  %v514_v26 = vadd.f32 %v1132_v45, %v494_v20 }
 0x114   : > { %556 = vmatpush.msra.mxu0 %v545_v38  ;;  %790 = vmatpush.msra.mxu1 %v545_v38  ;;  %v520_v10 = vmax.f32 %v504_v4, 0.0  ;;  %v521_v22 = vmax.f32 %v505_v16, 0.0  ;;  %v525_v23 = vmax.f32 %v509_v17, 0.0  ;;  %v518_v27 = vadd.f32 %v1132_v45, %v498_v21 }
 0x115   : > { %794 = vmatpush.msra.mxu2 %v544_v39  ;;  %795 = vmatpush.msra.mxu3 %v544_v39  ;;  %v506_v28 = vadd.f32 %v1132_v45, %v486_v24  ;;  %v510_v29 = vadd.f32 %v1132_v45, %v490_v25  ;;  %v530_v30 = vmax.f32 %v514_v26, 0.0 }
 0x116   : > { %557 = vmatpush.msra.mxu0 %v544_v39  ;;  %793 = vmatpush.msra.mxu1 %v544_v39  ;;  %v534_v31 = vmax.f32 %v518_v27, 0.0 }
 0x117   : > { %797 = vmatpush.msra.mxu2 %v543_v40  ;;  %798 = vmatpush.msra.mxu3 %v543_v40  ;;  %v522_v32 = vmax.f32 %v506_v28, 0.0  ;;  %v526_v33 = vmax.f32 %v510_v29, 0.0 }
 0x118   : > { %558 = vmatpush.msra.mxu0 %v543_v40  ;;  %796 = vmatpush.msra.mxu1 %v543_v40 }
 0x119   : > { %800 = vmatpush.msra.mxu2 %v542_v41  ;;  %801 = vmatpush.msra.mxu3 %v542_v41 }
 0x11a   : > { %559 = vmatpush.msra.mxu0 %v542_v41  ;;  %799 = vmatpush.msra.mxu1 %v542_v41 }
 0x11b   : > { %803 = vmatpush.msra.mxu2 %v541_v42  ;;  %804 = vmatpush.msra.mxu3 %v541_v42 }
 0x11c   : > { %560 = vmatpush.msra.mxu0 %v541_v42  ;;  %802 = vmatpush.msra.mxu1 %v541_v42 }
 0x11d   : > { %806 = vmatpush.msra.mxu2 %v540_v43  ;;  %807 = vmatpush.msra.mxu3 %v540_v43 }
 0x11e   : > { %561 = vmatpush.msra.mxu0 %v540_v43  ;;  %805 = vmatpush.msra.mxu1 %v540_v43 }
 0x11f   : > { %809 = vmatpush.msra.mxu2 %v539_v44  ;;  %810 = vmatpush.msra.mxu3 %v539_v44 }
 0x120   : > { %562 = vmatpush.msra.mxu0 %v539_v44  ;;  %808 = vmatpush.msra.mxu1 %v539_v44 }
 0x121   : > { %812 = vmatpush.msra.mxu2 %v538_v48  ;;  %813 = vmatpush.msra.mxu3 %v538_v48 }
 0x122   : > { %563 = vmatpush.msra.mxu0 %v538_v48  ;;  %811 = vmatpush.msra.mxu1 %v538_v48 }
 0x123   : > { %815 = vmatpush.msra.mxu2 %v537_v51  ;;  %816 = vmatpush.msra.mxu3 %v537_v51 }
 0x124   : > { %564 = vmatpush.msra.mxu0 %v537_v51  ;;  %814 = vmatpush.msra.mxu1 %v537_v51 }
 0x125   : > { %818 = vmatpush.msra.mxu2 %v536_v54  ;;  %819 = vmatpush.msra.mxu3 %v536_v54 }
 0x126   : > { %565 = vmatpush.msra.mxu0 %v536_v54  ;;  %817 = vmatpush.msra.mxu1 %v536_v54 }
 0x127   : > { %821 = vmatpush.msra.mxu2 %v535_v57  ;;  %822 = vmatpush.msra.mxu3 %v535_v57 }
 0x128   : > { %591 = vmatmul.f32.vlgmr.msra.gmra.mxu2 %v527_v58  ;;  %603 = vmatmul.f32.vlgmr.msra.gmra.mxu3 %v531_v59 }
 0x129   : > { %566 = vmatpush.msra.mxu0 %v535_v57  ;;  %820 = vmatpush.msra.mxu1 %v535_v57 }
 0x12a   : > { %567 = vmatmul.f32.vlgmr.msra.gmra.mxu0 %v519_v62  ;;  %579 = vmatmul.f32.vlgmr.msra.gmra.mxu1 %v523_v63 }
 0x130   : > { %594 = vmatmul.f32.gmra.mxu2 %v528_v6  ;;  %606 = vmatmul.f32.gmra.mxu3 %v532_v7 }
 0x132   : > { %570 = vmatmul.f32.gmra.mxu0 %v520_v10  ;;  %582 = vmatmul.f32.gmra.mxu1 %v524_v11 }
 0x138   : > { %597 = vmatmul.f32.gmra.mxu2 %v529_v18  ;;  %609 = vmatmul.f32.gmra.mxu3 %v533_v19 }
 0x13a   : > { %573 = vmatmul.f32.gmra.mxu0 %v521_v22  ;;  %585 = vmatmul.f32.gmra.mxu1 %v525_v23 }
 0x140   : > { %600 = vmatmul.f32.gmra.mxu2 %v530_v30  ;;  %612 = vmatmul.f32.gmra.mxu3 %v534_v31 }
 0x142   : > { %576 = vmatmul.f32.gmra.mxu0 %v522_v32  ;;  %588 = vmatmul.f32.gmra.mxu1 %v526_v33 }
 0x1a7   : > { %v568_v34 = vpop.f32.mrf.mxu0  ;;  %v580_v35 = vpop.f32.mrf.mxu1 }
 0x1a8   : > { %616 = vst [vmem:[%s1049_s27] sm:$0xff] %v568_v34 }
 0x1a9   : > { %620 = vst [vmem:[%s1049_s27 + $0x20] sm:$0xff] %v580_v35 }
 0x1ab   : > { %v592_v36 = vpop.f32.mrf.mxu2  ;;  %v604_v37 = vpop.f32.mrf.mxu3 }
 0x1ac   : > { %624 = vst [vmem:[%s1049_s27 + $0x40] sm:$0xff] %v592_v36 }
 0x1ad   : > { %628 = vst [vmem:[%s1049_s27 + $0x60] sm:$0xff] %v604_v37 }
 0x1af   : > { %v571_v38 = vpop.f32.mrf.mxu0  ;;  %v583_v39 = vpop.f32.mrf.mxu1 }
 0x1b0   : > { %617 = vst [vmem:[%s1049_s27 + $0x8] sm:$0xff] %v571_v38 }
 0x1b1   : > { %621 = vst [vmem:[%s1049_s27 + $0x28] sm:$0xff] %v583_v39 }
 0x1b3   : > { %v595_v40 = vpop.f32.mrf.mxu2  ;;  %v607_v41 = vpop.f32.mrf.mxu3 }
 0x1b4   : > { %625 = vst [vmem:[%s1049_s27 + $0x48] sm:$0xff] %v595_v40 }
 0x1b5   : > { %629 = vst [vmem:[%s1049_s27 + $0x68] sm:$0xff] %v607_v41 }
 0x1b7   : > { %v574_v42 = vpop.f32.mrf.mxu0  ;;  %v586_v43 = vpop.f32.mrf.mxu1 }
 0x1b8   : > { %618 = vst [vmem:[%s1049_s27 + $0x10] sm:$0xff] %v574_v42 }
 0x1b9   : > { %622 = vst [vmem:[%s1049_s27 + $0x30] sm:$0xff] %v586_v43 }
 0x1bb   : > { %v598_v44 = vpop.f32.mrf.mxu2  ;;  %v610_v45 = vpop.f32.mrf.mxu3 }
 0x1bc   : > { %626 = vst [vmem:[%s1049_s27 + $0x50] sm:$0xff] %v598_v44 }
 0x1bd   : > { %630 = vst [vmem:[%s1049_s27 + $0x70] sm:$0xff] %v610_v45 }
 0x1bf   : > { %v577_v46 = vpop.f32.mrf.mxu0  ;;  %v589_v47 = vpop.f32.mrf.mxu1 }
 0x1c0   : > { %619 = vst [vmem:[%s1049_s27 + $0x18] sm:$0xff] %v577_v46 }
 0x1c1   : > { %623 = vst [vmem:[%s1049_s27 + $0x38] sm:$0xff] %v589_v47 }
 0x1c3   : > { %v601_v48 = vpop.f32.mrf.mxu2  ;;  %v613_v49 = vpop.f32.mrf.mxu3 }
 0x1c4   : > { %627 = vst [vmem:[%s1049_s27 + $0x58] sm:$0xff] %v601_v48 }
 0x1c5   : > { %631 = vst [vmem:[%s1049_s27 + $0x78] sm:$0xff] %v613_v49 }
 0x1c6 PF: > { %s14_s21 = sadd.s32 1, %s936_s21   ;;  %s1204_s15 = smov %s916_s16 }
 0x1c7   : > { %p11_p13 = scmp.ge.s32.totalorder %s14_s21, 11   ;;  %s1205_s16 = smov %s1015_s28 }
 0x1c8   : > { %s1206_s17 = smov %s928_s19  ;;  %s1207_s18 = smov %s932_s20 }
 0x1c9   : > { %s1208_s19 = smov %s1211_s22  ;;  %s1209_s20 = smov %s1215_s23 }
 0x1ca   :  { %13 = sbr.rel (!%p11_p13) target bundleno = 4 (0x4), region = 118 }

// kernel: _gcn_forward_impl.5
= control target key start
LH: loop header
LB: loop body
LE: loop exit
PB: predicated region body
PF: predicated region fallthrough
CT: control target
= control target key end

     0   :  { %s732_s12 = smov 0   ;;  %s734_s13 = smov 0   ;;  %s932_s0 = inlined_call_operand.vmem [shape: f32[384,384], index: 0, kind: input, shape index: {}]   ;;  %s933_s1 = inlined_call_operand.vmem [shape: f32[384,128], index: 1, kind: input, shape index: {}]   ;;  %s934_s2 = inlined_call_operand.vmem [shape: f32[1,128], index: 2, kind: input, shape index: {}]   ;;  %s935_s3 = inlined_call_operand.vmem [shape: f32[384,128], index: 3, kind: output, shape index: {}]  }
   0x1   :  { %s736_s14 = smov 0   ;;  %s738_s15 = smov 0  }
   0x2   :  { %s740_s16 = smov 0   ;;  %s742_s17 = smov 0  }
   0x3   :  { %s744_s18 = smov 0  }
   0x4 LB: > { %s22_s19 = sadd.s32 1, %s702_s16  ;;  %s25_s20 = sadd.s32 1, %s706_s17  ;;  %s710_s18 = sphi %s744_s18, %s13_s18   ;;  %s706_s17 = sphi %s742_s17, %s941_s17   ;;  %s702_s16 = sphi %s740_s16, %s940_s16   ;;  %s698_s15 = sphi %s738_s15, %s939_s15   ;;  %s694_s14 = sphi %s736_s14, %s938_s14   ;;  %s690_s13 = sphi %s734_s13, %s937_s13   ;;  %s686_s12 = sphi %s732_s12, %s936_s12  }
   0x5   : > { %p23_p0 = scmp.ge.s32.totalorder %s22_s19, 3  ;;  %p41_p1 = scmp.ne.s32.totalorder %s690_s13, %s686_s12 }
   0x6   : > { %p42_p2 = scmp.eq.s32.totalorder %s710_s18, 0  ;;  %s34_s24 = sadd.s32 1, %s690_s13 }
   0x7   : > { %s943_s19 = smov (%p23_p0, %s22_s19), 0  ;;  %s945_s20 = smov (!%p23_p0, %s25_s20), %s706_s17 }
   0x8   : > { %p43_p3 = por %p42_p2, %p41_p1  ;;  %p27_p4 = scmp.ge.s32.totalorder %s945_s20, 3 }
   0x9   : > { %s30_s21 = ssub.s32 %s702_s16, %s943_s19  ;;  %p537_p6 = scmp.ge.s32.totalorder %s710_s18, 9 }
   0xa   : > { %s947_s20 = smov (%p27_p4, %s945_s20), 0 }
   0xb   : > { %s29_s22 = ssub.s32 %s706_s17, %s947_s20  ;;  %141 = sbr.rel (%p537_p6) target bundleno = 39 (0x27), region = 24 }
   0xc   : > { %s31_s23 = sor.u32 %s30_s21, %s29_s22 }
   0xd   : > { %p32_p5 = scmp.eq.s32.totalorder %s31_s23, 0 }
   0xf   : > { %s783_s25 = scalar_select %p32_p5, %s690_s13, %s34_s24  }
  0x10   : > { %144 = sbr.rel (!%p43_p3) target bundleno = 39 (0x27), region = 28  ;;  %s146_s26 = sand.u32 (%p43_p3), 1, %s690_s13  }
  0x11   : > { %s598_s27 = smul.u32 (%p43_p3), 48, %s706_s17  ;;  %s538_s28 = sshll.u32 (%p43_p3), %s146_s26, 7 }
  0x12   : > { %s148_s7 = scalar_lea.vmem (%p43_p3), [#allocation2], %s538_s28 }
  0x13   : > { %s151_s29 = sadd.s32 (%p43_p3), %s702_s16, %s598_s27 }
  0x14   : > { %s541_s30 = sshll.u32 (%p43_p3), %s151_s29, 3 }
  0x15   : > { %s792_s6 = scalar_lea.vmem %s932_s0, %s541_s30 }
  0x16   : > { %v212_v0 = vld [vmem:[%s792_s6] sm:$0xff]  ;;  %v214_v1 = vld [vmem:[%s792_s6 + $0x18] sm:$0xff]  ;;  %v216_v2 = vld [vmem:[%s792_s6 + $0x30] sm:$0xff] }
  0x17   : > { %213 = vst [vmem:[%s148_s7] sm:$0xff] %v212_v0  ;;  %v218_v3 = vld [vmem:[%s792_s6 + $0x48] sm:$0xff]  ;;  %v220_v4 = vld [vmem:[%s792_s6 + $0x60] sm:$0xff]  ;;  %v222_v5 = vld [vmem:[%s792_s6 + $0x78] sm:$0xff] }
  0x18   : > { %215 = vst [vmem:[%s148_s7 + $0x8] sm:$0xff] %v214_v1  ;;  %v224_v6 = vld [vmem:[%s792_s6 + $0x90] sm:$0xff]  ;;  %v226_v7 = vld [vmem:[%s792_s6 + $0xa8] sm:$0xff]  ;;  %v228_v8 = vld [vmem:[%s792_s6 + $0xc0] sm:$0xff] }
  0x19   : > { %217 = vst [vmem:[%s148_s7 + $0x10] sm:$0xff] %v216_v2  ;;  %v230_v9 = vld [vmem:[%s792_s6 + $0xd8] sm:$0xff]  ;;  %v232_v10 = vld [vmem:[%s792_s6 + $0xf0] sm:$0xff]  ;;  %v234_v11 = vld [vmem:[%s792_s6 + $0x108] sm:$0xff] }
  0x1a   : > { %219 = vst [vmem:[%s148_s7 + $0x18] sm:$0xff] %v218_v3  ;;  %v236_v12 = vld [vmem:[%s792_s6 + $0x120] sm:$0xff]  ;;  %v238_v13 = vld [vmem:[%s792_s6 + $0x138] sm:$0xff]  ;;  %v240_v14 = vld [vmem:[%s792_s6 + $0x150] sm:$0xff] }
  0x1b   : > { %221 = vst [vmem:[%s148_s7 + $0x20] sm:$0xff] %v220_v4  ;;  %v242_v15 = vld [vmem:[%s792_s6 + $0x168] sm:$0xff] }
  0x1c   : > { %223 = vst [vmem:[%s148_s7 + $0x28] sm:$0xff] %v222_v5 }
  0x1d   : > { %225 = vst [vmem:[%s148_s7 + $0x30] sm:$0xff] %v224_v6 }
  0x1e   : > { %227 = vst [vmem:[%s148_s7 + $0x38] sm:$0xff] %v226_v7 }
  0x1f   : > { %229 = vst [vmem:[%s148_s7 + $0x40] sm:$0xff] %v228_v8 }
  0x20   : > { %231 = vst [vmem:[%s148_s7 + $0x48] sm:$0xff] %v230_v9 }
  0x21   : > { %233 = vst [vmem:[%s148_s7 + $0x50] sm:$0xff] %v232_v10 }
  0x22   : > { %235 = vst [vmem:[%s148_s7 + $0x58] sm:$0xff] %v234_v11 }
  0x23   : > { %237 = vst [vmem:[%s148_s7 + $0x60] sm:$0xff] %v236_v12 }
  0x24   : > { %239 = vst [vmem:[%s148_s7 + $0x68] sm:$0xff] %v238_v13 }
  0x25   : > { %241 = vst [vmem:[%s148_s7 + $0x70] sm:$0xff] %v240_v14 }
  0x26   : > { %243 = vst [vmem:[%s148_s7 + $0x78] sm:$0xff] %v242_v15 }
  0x27 PF: > { %p542_p7 = scmp.ge.s32.totalorder %s710_s18, 1  ;;  %p248_p8 = scmp.lt.s32.totalorder %s710_s18, 10 }
  0x29   : > { %p249_p9 = pnand %p542_p7, %p248_p8 }
  0x2a   : > { %s255_s8 = sand.u32 (!%p249_p9), 1, %s686_s12   ;;  %s544_s9 = sshll.u32 (!%p249_p9), %s698_s15, 4 }
  0x2b   : > { %252 = sbr.rel (%p249_p9) target bundleno = 264 (0x108), region = 66  ;;  %s543_s10 = sshll.u32 (!%p249_p9), %s255_s8, 7 }
  0x2c   : > { %p280_p10 = scmp.lt.s32.totalorder (!%p249_p9), %s544_s9, 47  ;;  %s819_s24 = scalar_lea.vmem (!%p249_p9), [#allocation2], %s543_s10 }
  0x2d   : > { %p546_p11 = scmp.ne.s32.totalorder (!%p249_p9), %s694_s14, 0 }
  0x30   : > { %s949_s9 = smov (!%p280_p10, %s544_s9), 47  ;;  %288 = sbr.rel (%p546_p11) target bundleno = 70 (0x46), region = 74 }
  0x31   : > { %s545_s11 = sshll.u32 %s949_s9, 3 }
  0x32   : > { %s817_s23 = scalar_lea.vmem %s935_s3, %s545_s11 }
  0x35   : > { %v655_v16 = vld [vmem:[%s934_s2] ss:$0 sm:$0xff] }
  0x36   : > { %293 = vst [vmem:[%s817_s23] sm:$0xff] %v655_v16 }
  0x37   : > { %294 = vst [vmem:[%s817_s23 + $0x8] sm:$0xff] %v655_v16 }
  0x38   : > { %295 = vst [vmem:[%s817_s23 + $0x10] sm:$0xff] %v655_v16 }
  0x39   : > { %296 = vst [vmem:[%s817_s23 + $0x18] sm:$0xff] %v655_v16 }
  0x3a   : > { %297 = vst [vmem:[%s817_s23 + $0x20] sm:$0xff] %v655_v16 }
  0x3b   : > { %298 = vst [vmem:[%s817_s23 + $0x28] sm:$0xff] %v655_v16 }
  0x3c   : > { %299 = vst [vmem:[%s817_s23 + $0x30] sm:$0xff] %v655_v16 }
  0x3d   : > { %300 = vst [vmem:[%s817_s23 + $0x38] sm:$0xff] %v655_v16 }
  0x3e   : > { %301 = vst [vmem:[%s817_s23 + $0x40] sm:$0xff] %v655_v16 }
  0x3f   : > { %302 = vst [vmem:[%s817_s23 + $0x48] sm:$0xff] %v655_v16 }
  0x40   : > { %303 = vst [vmem:[%s817_s23 + $0x50] sm:$0xff] %v655_v16 }
  0x41   : > { %304 = vst [vmem:[%s817_s23 + $0x58] sm:$0xff] %v655_v16 }
  0x42   : > { %305 = vst [vmem:[%s817_s23 + $0x60] sm:$0xff] %v655_v16 }
  0x43   : > { %306 = vst [vmem:[%s817_s23 + $0x68] sm:$0xff] %v655_v16 }
  0x44   : > { %307 = vst [vmem:[%s817_s23 + $0x70] sm:$0xff] %v655_v16 }
  0x45   : > { %308 = vst [vmem:[%s817_s23 + $0x78] sm:$0xff] %v655_v16 }
  0x46 PF: > { %s547_s12 = sshll.u32 %s694_s14, 7  ;;  %v334_v33 = vld [vmem:[%s819_s24 + $0x40] sm:$0xff]  ;;  %v335_v37 = vld [vmem:[%s819_s24 + $0x48] sm:$0xff]  ;;  %v336_v41 = vld [vmem:[%s819_s24 + $0x50] sm:$0xff] }
  0x47   : > { %s845_s29 = scalar_lea.vmem %s933_s1, %s547_s12  ;;  %v338_v34 = vld [vmem:[%s819_s24 + $0x60] sm:$0xff]  ;;  %v339_v38 = vld [vmem:[%s819_s24 + $0x68] sm:$0xff]  ;;  %v340_v42 = vld [vmem:[%s819_s24 + $0x70] sm:$0xff] }
  0x48   : > { %v358_v17 = vld [vmem:[%s845_s29 + $0x78] sm:$0xff]  ;;  %v357_v18 = vld [vmem:[%s845_s29 + $0x70] sm:$0xff]  ;;  %v356_v19 = vld [vmem:[%s845_s29 + $0x68] sm:$0xff] }
  0x49   : > { %551 = vmatpush.msra.mxu2 %v358_v17  ;;  %552 = vmatpush.msra.mxu3 %v358_v17  ;;  %v355_v20 = vld [vmem:[%s845_s29 + $0x60] sm:$0xff]  ;;  %v354_v21 = vld [vmem:[%s845_s29 + $0x58] sm:$0xff]  ;;  %v353_v22 = vld [vmem:[%s845_s29 + $0x50] sm:$0xff] }
  0x4a   : > { %359 = vmatpush.msra.mxu0 %v358_v17  ;;  %550 = vmatpush.msra.mxu1 %v358_v17  ;;  %v352_v23 = vld [vmem:[%s845_s29 + $0x48] sm:$0xff]  ;;  %v351_v24 = vld [vmem:[%s845_s29 + $0x40] sm:$0xff]  ;;  %v350_v25 = vld [vmem:[%s845_s29 + $0x38] sm:$0xff] }
  0x4b   : > { %554 = vmatpush.msra.mxu2 %v357_v18  ;;  %555 = vmatpush.msra.mxu3 %v357_v18  ;;  %v349_v26 = vld [vmem:[%s845_s29 + $0x30] sm:$0xff]  ;;  %v348_v27 = vld [vmem:[%s845_s29 + $0x28] sm:$0xff]  ;;  %v347_v28 = vld [vmem:[%s845_s29 + $0x20] sm:$0xff] }
  0x4c   : > { %360 = vmatpush.msra.mxu0 %v357_v18  ;;  %553 = vmatpush.msra.mxu1 %v357_v18  ;;  %v346_v29 = vld [vmem:[%s845_s29 + $0x18] sm:$0xff]  ;;  %v345_v30 = vld [vmem:[%s845_s29 + $0x10] sm:$0xff]  ;;  %v344_v31 = vld [vmem:[%s845_s29 + $0x8] sm:$0xff] }
  0x4d   : > { %557 = vmatpush.msra.mxu2 %v356_v19  ;;  %558 = vmatpush.msra.mxu3 %v356_v19  ;;  %v343_v32 = vld [vmem:[%s845_s29] sm:$0xff]  ;;  %v327_v39 = vld [vmem:[%s819_s24 + $0x8] sm:$0xff]  ;;  %v328_v43 = vld [vmem:[%s819_s24 + $0x10] sm:$0xff] }
  0x4e   : > { %361 = vmatpush.msra.mxu0 %v356_v19  ;;  %556 = vmatpush.msra.mxu1 %v356_v19  ;;  %v326_v35 = vld [vmem:[%s819_s24] sm:$0xff]  ;;  %v331_v40 = vld [vmem:[%s819_s24 + $0x28] sm:$0xff]  ;;  %v332_v44 = vld [vmem:[%s819_s24 + $0x30] sm:$0xff] }
  0x4f   : > { %560 = vmatpush.msra.mxu2 %v355_v20  ;;  %561 = vmatpush.msra.mxu3 %v355_v20  ;;  %v330_v36 = vld [vmem:[%s819_s24 + $0x20] sm:$0xff]  ;;  %v337_v45 = vld [vmem:[%s819_s24 + $0x58] sm:$0xff]  ;;  %v311_v61 = vld [vmem:[%s817_s23 + $0x8] sm:$0xff] }
  0x50   : > { %362 = vmatpush.msra.mxu0 %v355_v20  ;;  %559 = vmatpush.msra.mxu1 %v355_v20  ;;  %v341_v46 = vld [vmem:[%s819_s24 + $0x78] sm:$0xff]  ;;  %v310_v49 = vld [vmem:[%s817_s23] sm:$0xff]  ;;  %v315_v62 = vld [vmem:[%s817_s23 + $0x28] sm:$0xff] }
  0x51   : > { %563 = vmatpush.msra.mxu2 %v354_v21  ;;  %564 = vmatpush.msra.mxu3 %v354_v21  ;;  %v329_v47 = vld [vmem:[%s819_s24 + $0x18] sm:$0xff]  ;;  %v314_v50 = vld [vmem:[%s817_s23 + $0x20] sm:$0xff]  ;;  %v319_v3 = vld [vmem:[%s817_s23 + $0x48] sm:$0xff] }
  0x52   : > { %363 = vmatpush.msra.mxu0 %v354_v21  ;;  %562 = vmatpush.msra.mxu1 %v354_v21  ;;  %v333_v48 = vld [vmem:[%s819_s24 + $0x38] sm:$0xff]  ;;  %v318_v55 = vld [vmem:[%s817_s23 + $0x40] sm:$0xff]  ;;  %v323_v4 = vld [vmem:[%s817_s23 + $0x68] sm:$0xff] }
  0x53   : > { %566 = vmatpush.msra.mxu2 %v353_v22  ;;  %567 = vmatpush.msra.mxu3 %v353_v22  ;;  %v322_v56 = vld [vmem:[%s817_s23 + $0x60] sm:$0xff]  ;;  %v312_v9 = vld [vmem:[%s817_s23 + $0x10] sm:$0xff]  ;;  %v313_v21 = vld [vmem:[%s817_s23 + $0x18] sm:$0xff] }
  0x54   : > { %364 = vmatpush.msra.mxu0 %v353_v22  ;;  %565 = vmatpush.msra.mxu1 %v353_v22  ;;  %v316_v10 = vld [vmem:[%s817_s23 + $0x30] sm:$0xff]  ;;  %v317_v22 = vld [vmem:[%s817_s23 + $0x38] sm:$0xff] }
  0x55   : > { %569 = vmatpush.msra.mxu2 %v352_v23  ;;  %570 = vmatpush.msra.mxu3 %v352_v23  ;;  %v320_v15 = vld [vmem:[%s817_s23 + $0x50] sm:$0xff] }
  0x56   : > { %365 = vmatpush.msra.mxu0 %v352_v23  ;;  %568 = vmatpush.msra.mxu1 %v352_v23  ;;  %v324_v16 = vld [vmem:[%s817_s23 + $0x70] sm:$0xff] }
  0x57   : > { %572 = vmatpush.msra.mxu2 %v351_v24  ;;  %573 = vmatpush.msra.mxu3 %v351_v24 }
  0x58   : > { %366 = vmatpush.msra.mxu0 %v351_v24  ;;  %571 = vmatpush.msra.mxu1 %v351_v24 }
  0x59   : > { %575 = vmatpush.msra.mxu2 %v350_v25  ;;  %576 = vmatpush.msra.mxu3 %v350_v25 }
  0x5a   : > { %367 = vmatpush.msra.mxu0 %v350_v25  ;;  %574 = vmatpush.msra.mxu1 %v350_v25 }
  0x5b   : > { %578 = vmatpush.msra.mxu2 %v349_v26  ;;  %579 = vmatpush.msra.mxu3 %v349_v26 }
  0x5c   : > { %368 = vmatpush.msra.mxu0 %v349_v26  ;;  %577 = vmatpush.msra.mxu1 %v349_v26 }
  0x5d   : > { %581 = vmatpush.msra.mxu2 %v348_v27  ;;  %582 = vmatpush.msra.mxu3 %v348_v27 }
  0x5e   : > { %369 = vmatpush.msra.mxu0 %v348_v27  ;;  %580 = vmatpush.msra.mxu1 %v348_v27  ;;  %v321_v27 = vld [vmem:[%s817_s23 + $0x58] sm:$0xff] }
  0x5f   : > { %584 = vmatpush.msra.mxu2 %v347_v28  ;;  %585 = vmatpush.msra.mxu3 %v347_v28 }
  0x60   : > { %370 = vmatpush.msra.mxu0 %v347_v28  ;;  %583 = vmatpush.msra.mxu1 %v347_v28  ;;  %v325_v28 = vld [vmem:[%s817_s23 + $0x78] sm:$0xff] }
  0x61   : > { %587 = vmatpush.msra.mxu2 %v346_v29  ;;  %588 = vmatpush.msra.mxu3 %v346_v29 }
  0x62   : > { %371 = vmatpush.msra.mxu0 %v346_v29  ;;  %586 = vmatpush.msra.mxu1 %v346_v29 }
  0x63   : > { %590 = vmatpush.msra.mxu2 %v345_v30  ;;  %591 = vmatpush.msra.mxu3 %v345_v30 }
  0x64   : > { %372 = vmatpush.msra.mxu0 %v345_v30  ;;  %589 = vmatpush.msra.mxu1 %v345_v30 }
  0x65   : > { %593 = vmatpush.msra.mxu2 %v344_v31  ;;  %594 = vmatpush.msra.mxu3 %v344_v31 }
  0x66   : > { %373 = vmatpush.msra.mxu0 %v344_v31  ;;  %592 = vmatpush.msra.mxu1 %v344_v31 }
  0x67   : > { %596 = vmatpush.msra.mxu2 %v343_v32  ;;  %597 = vmatpush.msra.mxu3 %v343_v32 }
  0x68   : > { %399 = vmatmul.f32.vlgmr.msra.gmra.mxu2 %v334_v33  ;;  %411 = vmatmul.f32.vlgmr.msra.gmra.mxu3 %v338_v34 }
  0x69   : > { %374 = vmatpush.msra.mxu0 %v343_v32  ;;  %595 = vmatpush.msra.mxu1 %v343_v32 }
  0x6a   : > { %375 = vmatmul.f32.vlgmr.msra.gmra.mxu0 %v326_v35  ;;  %387 = vmatmul.f32.vlgmr.msra.gmra.mxu1 %v330_v36 }
  0x70   : > { %402 = vmatmul.f32.gmra.mxu2 %v335_v37  ;;  %414 = vmatmul.f32.gmra.mxu3 %v339_v38 }
  0x72   : > { %378 = vmatmul.f32.gmra.mxu0 %v327_v39  ;;  %390 = vmatmul.f32.gmra.mxu1 %v331_v40 }
  0x78   : > { %405 = vmatmul.f32.gmra.mxu2 %v336_v41  ;;  %417 = vmatmul.f32.gmra.mxu3 %v340_v42 }
  0x7a   : > { %381 = vmatmul.f32.gmra.mxu0 %v328_v43  ;;  %393 = vmatmul.f32.gmra.mxu1 %v332_v44 }
  0x80   : > { %408 = vmatmul.f32.gmra.mxu2 %v337_v45  ;;  %420 = vmatmul.f32.gmra.mxu3 %v341_v46 }
  0x82   : > { %384 = vmatmul.f32.gmra.mxu0 %v329_v47  ;;  %396 = vmatmul.f32.gmra.mxu1 %v333_v48 }
  0xe7   : > { %v376_v51 = vpop.f32.mrf.mxu0  ;;  %v388_v52 = vpop.f32.mrf.mxu1 }
  0xe8   : > { %v424_v53 = vadd.f32 %v376_v51, %v310_v49  ;;  %v428_v54 = vadd.f32 %v388_v52, %v314_v50 }
  0xea   : > { %440 = vst [vmem:[%s817_s23] sm:$0xff] %v424_v53 }
  0xeb   : > { %444 = vst [vmem:[%s817_s23 + $0x20] sm:$0xff] %v428_v54  ;;  %v400_v57 = vpop.f32.mrf.mxu2  ;;  %v412_v58 = vpop.f32.mrf.mxu3 }
  0xec   : > { %v432_v59 = vadd.f32 %v400_v57, %v318_v55  ;;  %v436_v60 = vadd.f32 %v412_v58, %v322_v56 }
  0xee   : > { %448 = vst [vmem:[%s817_s23 + $0x40] sm:$0xff] %v432_v59 }
  0xef   : > { %452 = vst [vmem:[%s817_s23 + $0x60] sm:$0xff] %v436_v60  ;;  %v379_v63 = vpop.f32.mrf.mxu0  ;;  %v391_v0 = vpop.f32.mrf.mxu1 }
  0xf0   : > { %v425_v1 = vadd.f32 %v379_v63, %v311_v61  ;;  %v429_v2 = vadd.f32 %v391_v0, %v315_v62 }
  0xf2   : > { %441 = vst [vmem:[%s817_s23 + $0x8] sm:$0xff] %v425_v1 }
  0xf3   : > { %445 = vst [vmem:[%s817_s23 + $0x28] sm:$0xff] %v429_v2  ;;  %v403_v5 = vpop.f32.mrf.mxu2  ;;  %v415_v6 = vpop.f32.mrf.mxu3 }
  0xf4   : > { %v433_v7 = vadd.f32 %v403_v5, %v319_v3  ;;  %v437_v8 = vadd.f32 %v415_v6, %v323_v4 }
  0xf6   : > { %449 = vst [vmem:[%s817_s23 + $0x48] sm:$0xff] %v433_v7 }
  0xf7   : > { %453 = vst [vmem:[%s817_s23 + $0x68] sm:$0xff] %v437_v8  ;;  %v382_v11 = vpop.f32.mrf.mxu0  ;;  %v394_v12 = vpop.f32.mrf.mxu1 }
  0xf8   : > { %v426_v13 = vadd.f32 %v382_v11, %v312_v9  ;;  %v430_v14 = vadd.f32 %v394_v12, %v316_v10 }
  0xfa   : > { %442 = vst [vmem:[%s817_s23 + $0x10] sm:$0xff] %v426_v13 }
  0xfb   : > { %446 = vst [vmem:[%s817_s23 + $0x30] sm:$0xff] %v430_v14  ;;  %v406_v17 = vpop.f32.mrf.mxu2  ;;  %v418_v18 = vpop.f32.mrf.mxu3 }
  0xfc   : > { %v434_v19 = vadd.f32 %v406_v17, %v320_v15  ;;  %v438_v20 = vadd.f32 %v418_v18, %v324_v16 }
  0xfe   : > { %450 = vst [vmem:[%s817_s23 + $0x50] sm:$0xff] %v434_v19 }
  0xff   : > { %454 = vst [vmem:[%s817_s23 + $0x70] sm:$0xff] %v438_v20  ;;  %v385_v23 = vpop.f32.mrf.mxu0  ;;  %v397_v24 = vpop.f32.mrf.mxu1 }
 0x100   : > { %v427_v25 = vadd.f32 %v385_v23, %v313_v21  ;;  %v431_v26 = vadd.f32 %v397_v24, %v317_v22 }
 0x102   : > { %443 = vst [vmem:[%s817_s23 + $0x18] sm:$0xff] %v427_v25 }
 0x103   : > { %447 = vst [vmem:[%s817_s23 + $0x38] sm:$0xff] %v431_v26  ;;  %v409_v29 = vpop.f32.mrf.mxu2  ;;  %v421_v30 = vpop.f32.mrf.mxu3 }
 0x104   : > { %v435_v31 = vadd.f32 %v409_v29, %v321_v27  ;;  %v439_v32 = vadd.f32 %v421_v30, %v325_v28 }
 0x106   : > { %451 = vst [vmem:[%s817_s23 + $0x58] sm:$0xff] %v435_v31 }
 0x107   : > { %455 = vst [vmem:[%s817_s23 + $0x78] sm:$0xff] %v439_v32 }
 0x108 PF: > { %s13_s18 = sadd.s32 1, %s710_s18   ;;  %s936_s12 = smov %s690_s13 }
 0x109   : > { %p10_p12 = scmp.ge.s32.totalorder %s13_s18, 11   ;;  %s937_s13 = smov %s783_s25 }
 0x10a   : > { %s938_s14 = smov %s702_s16  ;;  %s939_s15 = smov %s706_s17 }
 0x10b   : > { %s940_s16 = smov %s943_s19  ;;  %s941_s17 = smov %s947_s20 }
 0x10c   :  { %12 = sbr.rel (!%p10_p12) target bundleno = 4 (0x4), region = 110 }

</bundles_post_ra>
